<compile_context>
chip_gen: v5e
topology: v5e:2x2
jax: 0.10.0
libtpu: 0.0.40
codegen_flags: <defaults>
</compile_context>

<pallas_src>
import functools

import jax
import jax.numpy as jnp
from jax.experimental import pallas as pl
from jax.experimental.pallas import tpu as pltpu


def _round_up(x, m):
    return (x + m - 1) // m * m


# ----------------------------------------------------------------------------
# Fused GCN kernel: IB images of (C, H*W) in, IB images of (Cout, H*W) out.
# ----------------------------------------------------------------------------
def _gcn_kernel(x_ref, w1_ref, w2_ref, o_ref, xstg, xcol1, xcol2, *,
                C, Cout, H, W, k, R, IB):
    f32 = jnp.float32
    xdt = xcol1.dtype                       # MXU operand dtype (f32 or bf16)
    p = (k - 1) // 2
    S = H * W                               # valid (output) lanes per image
    E = (H + 2 * p) * W                     # embedded (H-padded) lanes per image
    kR = k * R
    D = xcol1.shape[0]                      # 2*k*R + 1 (last row = ones for bias)
    XOFF = p * W                            # left halo of the staging buffer
    LX = xstg.shape[1]
    LC1 = xcol1.shape[1]
    LC2 = xcol2.shape[1]

    # ---- hoisted lane masks (shared by every image in the step) -------------
    def wcoord(width):
        lane = jax.lax.broadcasted_iota(jnp.int32, (1, width), 1)
        return (lane & (W - 1)) if (W & (W - 1)) == 0 else lane % W

    w_s = wcoord(S)
    # W-boundary masks for the conv_l2 taps; the center tap (t == p) is always
    # in-bounds and conv_r1 needs no tap masks at all (see keep_w below).
    tap_mask = {t: (w_s + (t - p) >= 0) & (w_s + (t - p) < W)
                for t in range(k) if t != p}
    w_e = wcoord(LC1)
    keep_w = (w_e >= p) & (w_e < W - p)     # conv_r1 has no W padding

    # ---- ones rows: fold all biases into the MXU contractions ---------------
    xcol1[D - 1:D, :] = jnp.ones((1, LC1), xdt)
    xcol2[D - 1:D, :] = jnp.ones((1, LC2), xdt)

    # ---- stage the input: per-image embedded grid with real zero H padding --
    # Targeted zeroing only (no full scratch clear): unused channel rows, the
    # outer halos reached by the widest (p*W) H-taps, and the H-pad strips.
    if C < R:
        xstg[C:R, :] = jnp.zeros((R - C, LX), f32)
    xstg[0:C, 0:XOFF] = jnp.zeros((C, XOFF), f32)
    xstg[0:C, XOFF + IB * E:LX] = jnp.zeros((C, LX - XOFF - IB * E), f32)
    for b in range(IB):
        xb = XOFF + b * E
        xstg[0:C, xb:xb + p * W] = jnp.zeros((C, p * W), f32)
        xstg[0:C, xb + p * W + S:xb + E] = jnp.zeros((C, p * W), f32)
        xstg[0:C, xb + p * W:xb + p * W + S] = x_ref[b].astype(f32)

    # ---- layer 1: conv_l1 (along H) + conv_r1 (along W) in ONE fused dot ----
    # xcol1 rows [0,kR): H-taps of x, rows [kR,2kR): W-taps of x, row 2kR: ones.
    for b in range(IB):
        xb = XOFF + b * E
        c0 = b * E
        for t in range(k):
            xcol1[t * R:(t + 1) * R, c0:c0 + E] = \
                xstg[:, xb + (t - p) * W:xb + (t - p) * W + E].astype(xdt)
            xcol1[kR + t * R:kR + (t + 1) * R, c0:c0 + E] = \
                xstg[:, xb + (t - p):xb + (t - p) + E].astype(xdt)

    out1 = jnp.dot(w1_ref[...], xcol1[...], preferred_element_type=f32)
    l1 = out1[0:R]                                   # conv_l1 (+ bias), (R, LC1)
    # conv_r1 output (W-zero-padded for conv_r2): zero outside w in [p, W-p);
    # inside that range every W tap was in-bounds, so no per-tap masks needed.
    r1 = jnp.where(keep_w, out1[R:2 * R], 0.0)

    # ---- layer 2: conv_l2(l1) + conv_r2(r1), summed inside ONE dot ----------
    # Evaluated only on the S valid output lanes; l1's H-pad margins give the
    # +-p lane headroom needed for the W-tap slices (masked positions anyway).
    for b in range(IB):
        cv = b * E
        cs = b * S
        for t in range(k):
            src = l1[:, cv + p * W + (t - p):cv + p * W + (t - p) + S]
            if t != p:
                src = jnp.where(tap_mask[t], src, 0.0)
            xcol2[t * R:(t + 1) * R, cs:cs + S] = src.astype(xdt)
            xcol2[kR + t * R:kR + (t + 1) * R, cs:cs + S] = \
                r1[:, cv + t * W:cv + t * W + S].astype(xdt)

    out2 = jnp.dot(w2_ref[...], xcol2[...], preferred_element_type=f32)
    for b in range(IB):
        o_ref[b] = out2[:, b * S:(b + 1) * S].astype(o_ref.dtype)


# ----------------------------------------------------------------------------
# Wrapper: free reshapes + tiny weight repacking only; all FLOPs in the kernel.
# ----------------------------------------------------------------------------
def gcn_forward(x_nchw, params, k=7, images_per_step=None,
                mxu_dtype=jnp.float32):
    N, C, H, W = x_nchw.shape
    Cout = params['w_l1'].shape[0]
    assert k % 2 == 1
    p = (k - 1) // 2
    S = H * W
    E = (H + 2 * p) * W
    R = _round_up(max(C, Cout), 8)          # channel rows (sublane multiple)
    kR = k * R
    D = 2 * kR + 1                          # xcol depth incl. the bias ones row

    if images_per_step is None:
        # Keep >= 2 grid steps so both v7x TensorCores stay busy; batching more
        # images per step mainly matters for large N (amortizes step overhead).
        images_per_step = 2 if (N >= 4 and N % 2 == 0) else 1
    IB = images_per_step
    assert N % IB == 0

    XOFF = p * W
    LX = _round_up(XOFF + IB * E + p * W, 128)   # staging width (both halos)
    LC1 = _round_up(IB * E, 128)
    LC2 = IB * S

    # Channels on sublanes, row-major flattened spatial on lanes: a free
    # reshape of NCHW (no transpose, no wrapper padding of activations).
    x_flat = x_nchw.reshape(N, C, S)

    def wblock(w, cin):
        # (Cout, cin, k) -> (Cout, k*R); column t*R + r <- w[:, r, t],
        # zero for the padded channel rows r in [cin, R).
        wp = jnp.zeros((Cout, R, k), jnp.float32).at[:, :cin, :].set(
            w.astype(jnp.float32))
        return jnp.transpose(wp, (0, 2, 1)).reshape(Cout, kR)

    # Layer-1 packed weights: block-diagonal (l1 -> rows [0,Cout),
    # r1 -> rows [R,R+Cout)), bias in the last column (times the ones row).
    W1 = jnp.zeros((2 * R, D), jnp.float32)
    W1 = W1.at[:Cout, :kR].set(wblock(params['w_l1'], C))
    W1 = W1.at[R:R + Cout, kR:2 * kR].set(wblock(params['w_r1'], C))
    W1 = W1.at[:Cout, D - 1].set(params['b_l1'].astype(jnp.float32))
    W1 = W1.at[R:R + Cout, D - 1].set(params['b_r1'].astype(jnp.float32))

    # Layer-2 packed weights: l2 and r2 are summed, so they share output rows.
    W2 = jnp.zeros((Cout, D), jnp.float32)
    W2 = W2.at[:, :kR].set(wblock(params['w_l2'], Cout))
    W2 = W2.at[:, kR:2 * kR].set(wblock(params['w_r2'], Cout))
    W2 = W2.at[:, D - 1].set(
        (params['b_l2'] + params['b_r2']).astype(jnp.float32))

    W1 = W1.astype(mxu_dtype)
    W2 = W2.astype(mxu_dtype)

    kernel = functools.partial(_gcn_kernel, C=C, Cout=Cout, H=H, W=W, k=k,
                               R=R, IB=IB)

    out = pl.pallas_call(
        kernel,
        out_shape=jax.ShapeDtypeStruct((N, Cout, S), x_nchw.dtype),
        grid=(N // IB,),
        in_specs=[
            pl.BlockSpec((IB, C, S), lambda n: (n, 0, 0)),
            pl.BlockSpec((2 * R, D), lambda n: (0, 0)),
            pl.BlockSpec((Cout, D), lambda n: (0, 0)),
        ],
        out_specs=pl.BlockSpec((IB, Cout, S), lambda n: (n, 0, 0)),
        # VMEM per step is a few hundred KiB here; re-derive against ~48 MiB
        # usable when scaling C/H*W/images_per_step on v7x (64 MiB VMEM).
        scratch_shapes=[
            pltpu.VMEM((R, LX), jnp.float32),     # haloed input staging
            pltpu.VMEM((D, LC1), mxu_dtype),      # layer-1 im2col (persistent)
            pltpu.VMEM((D, LC2), mxu_dtype),      # layer-2 im2col (persistent)
        ],
        compiler_params=pltpu.CompilerParams(
            dimension_semantics=("parallel",)),   # megacore over the batch
    )(x_flat, W1, W2)

    return out.reshape(N, Cout, H, W)


# ----------------------------------------------------------------------------
# Pure-JAX reference (same math as the PyTorch module) for a correctness check.
# ----------------------------------------------------------------------------
def gcn_reference(x_nchw, params, k=7):
    p = (k - 1) // 2

    def conv(x, w, b, along_h, pad):
        wf = w[:, :, :, None] if along_h else w[:, :, None, :]
        y = jax.lax.conv_general_dilated(
            x, wf, window_strides=(1, 1), padding=pad,
            dimension_numbers=('NCHW', 'OIHW', 'NCHW'))
        return y + b.reshape(1, -1, 1, 1)

    xl = conv(x_nchw, params['w_l1'], params['b_l1'], True,  ((p, p), (0, 0)))
    xl = conv(xl,     params['w_l2'], params['b_l2'], False, ((0, 0), (p, p)))
    xr = conv(x_nchw, params['w_r1'], params['b_r1'], False, ((p, p), (0, 0)))
    xr = conv(xr,     params['w_r2'], params['b_r2'], True,  ((0, 0), (p, p)))
    return xl + xr


if __name__ == "__main__":
    N, C, H, W = 2, 4, 16, 16
    out_c, k = 8, 7

    key = jax.random.PRNGKey(0)
    ks = jax.random.split(key, 9)
    x = jax.random.normal(ks[0], (N, C, H, W), jnp.float32)

    def winit(kw, cout, cin):
        return 0.1 * jax.random.normal(kw, (cout, cin, k), jnp.float32)

    params = {
        'w_l1': winit(ks[1], out_c, C),       # conv_l1: (k,1) kernel
        'b_l1': 0.1 * jax.random.normal(ks[2], (out_c,), jnp.float32),
        'w_l2': winit(ks[3], out_c, out_c),   # conv_l2: (1,k) kernel
        'b_l2': 0.1 * jax.random.normal(ks[4], (out_c,), jnp.float32),
        'w_r1': winit(ks[5], out_c, C),       # conv_r1: (1,k) kernel
        'b_r1': 0.1 * jax.random.normal(ks[6], (out_c,), jnp.float32),
        'w_r2': winit(ks[7], out_c, out_c),   # conv_r2: (k,1) kernel
        'b_r2': 0.1 * jax.random.normal(ks[8], (out_c,), jnp.float32),
    }

    y = gcn_forward(x, params, k=k)           # f32 MXU path (exact parity check)
    jax.block_until_ready(y)

    y_ref = gcn_reference(x, params, k=k)
    assert y.shape == (N, out_c, H, W), y.shape
    assert jnp.allclose(y, y_ref, atol=1e-4, rtol=1e-4), \
        float(jnp.max(jnp.abs(y - y_ref)))

    print("KERNEL_OK")
</pallas_src>

<mosaic_0001>
module attributes {stable_mosaic.version = 11 : i64} {
  func.func @_gcn_kernel(%arg0: i32, %arg1: memref<1x4x256xf32, #tpu.memory_space<vmem>>, %arg2: memref<16x113xf32, #tpu.memory_space<vmem>>, %arg3: memref<8x113xf32, #tpu.memory_space<vmem>>, %arg4: memref<1x8x256xf32, #tpu.memory_space<vmem>>, %arg5: memref<8x512xf32, #tpu.memory_space<vmem>>, %arg6: memref<113x384xf32, #tpu.memory_space<vmem>>, %arg7: memref<113x256xf32, #tpu.memory_space<vmem>>) attributes {dimension_semantics = [#tpu.dimension_semantics<parallel>], iteration_bounds = array<i64: 2>, scalar_prefetch = 0 : i64, scratch_operands = 3 : i64, tpu.core_type = #tpu.core_type<tc>, window_params = [{transform_indices = @transform_0, window_bounds = array<i64: 1, 4, 256>}, {pipeline_mode = #tpu.pipeline_mode<synchronous>, transform_indices = @transform_1, window_bounds = array<i64: 16, 113>}, {pipeline_mode = #tpu.pipeline_mode<synchronous>, transform_indices = @transform_2, window_bounds = array<i64: 8, 113>}, {transform_indices = @transform_3, window_bounds = array<i64: 1, 8, 256>}]} {
    %0 = tpu.iota {dimensions = array<i32: 1>} : vector<1x256xi32>
    %c15_i32 = arith.constant 15 : i32
    %1 = vector.broadcast %c15_i32 : i32 to vector<1x256xi32>
    %2 = arith.andi %0, %1 : vector<1x256xi32>
    %c-3_i32 = arith.constant -3 : i32
    %3 = vector.broadcast %c-3_i32 : i32 to vector<1x256xi32>
    %4 = arith.addi %2, %3 : vector<1x256xi32>
    %c0_i32 = arith.constant 0 : i32
    %5 = vector.broadcast %c0_i32 : i32 to vector<1x256xi32>
    %6 = arith.cmpi sge, %4, %5 : vector<1x256xi32>
    %c-3_i32_0 = arith.constant -3 : i32
    %7 = vector.broadcast %c-3_i32_0 : i32 to vector<1x256xi32>
    %8 = arith.addi %2, %7 : vector<1x256xi32>
    %c16_i32 = arith.constant 16 : i32
    %9 = vector.broadcast %c16_i32 : i32 to vector<1x256xi32>
    %10 = arith.cmpi slt, %8, %9 : vector<1x256xi32>
    %11 = arith.andi %6, %10 : vector<1x256xi1>
    %c-2_i32 = arith.constant -2 : i32
    %12 = vector.broadcast %c-2_i32 : i32 to vector<1x256xi32>
    %13 = arith.addi %2, %12 : vector<1x256xi32>
    %c0_i32_1 = arith.constant 0 : i32
    %14 = vector.broadcast %c0_i32_1 : i32 to vector<1x256xi32>
    %15 = arith.cmpi sge, %13, %14 : vector<1x256xi32>
    %c-2_i32_2 = arith.constant -2 : i32
    %16 = vector.broadcast %c-2_i32_2 : i32 to vector<1x256xi32>
    %17 = arith.addi %2, %16 : vector<1x256xi32>
    %c16_i32_3 = arith.constant 16 : i32
    %18 = vector.broadcast %c16_i32_3 : i32 to vector<1x256xi32>
    %19 = arith.cmpi slt, %17, %18 : vector<1x256xi32>
    %20 = arith.andi %15, %19 : vector<1x256xi1>
    %c-1_i32 = arith.constant -1 : i32
    %21 = vector.broadcast %c-1_i32 : i32 to vector<1x256xi32>
    %22 = arith.addi %2, %21 : vector<1x256xi32>
    %c0_i32_4 = arith.constant 0 : i32
    %23 = vector.broadcast %c0_i32_4 : i32 to vector<1x256xi32>
    %24 = arith.cmpi sge, %22, %23 : vector<1x256xi32>
    %c-1_i32_5 = arith.constant -1 : i32
    %25 = vector.broadcast %c-1_i32_5 : i32 to vector<1x256xi32>
    %26 = arith.addi %2, %25 : vector<1x256xi32>
    %c16_i32_6 = arith.constant 16 : i32
    %27 = vector.broadcast %c16_i32_6 : i32 to vector<1x256xi32>
    %28 = arith.cmpi slt, %26, %27 : vector<1x256xi32>
    %29 = arith.andi %24, %28 : vector<1x256xi1>
    %c1_i32 = arith.constant 1 : i32
    %30 = vector.broadcast %c1_i32 : i32 to vector<1x256xi32>
    %31 = arith.addi %2, %30 : vector<1x256xi32>
    %c0_i32_7 = arith.constant 0 : i32
    %32 = vector.broadcast %c0_i32_7 : i32 to vector<1x256xi32>
    %33 = arith.cmpi sge, %31, %32 : vector<1x256xi32>
    %c1_i32_8 = arith.constant 1 : i32
    %34 = vector.broadcast %c1_i32_8 : i32 to vector<1x256xi32>
    %35 = arith.addi %2, %34 : vector<1x256xi32>
    %c16_i32_9 = arith.constant 16 : i32
    %36 = vector.broadcast %c16_i32_9 : i32 to vector<1x256xi32>
    %37 = arith.cmpi slt, %35, %36 : vector<1x256xi32>
    %38 = arith.andi %33, %37 : vector<1x256xi1>
    %c2_i32 = arith.constant 2 : i32
    %39 = vector.broadcast %c2_i32 : i32 to vector<1x256xi32>
    %40 = arith.addi %2, %39 : vector<1x256xi32>
    %c0_i32_10 = arith.constant 0 : i32
    %41 = vector.broadcast %c0_i32_10 : i32 to vector<1x256xi32>
    %42 = arith.cmpi sge, %40, %41 : vector<1x256xi32>
    %c2_i32_11 = arith.constant 2 : i32
    %43 = vector.broadcast %c2_i32_11 : i32 to vector<1x256xi32>
    %44 = arith.addi %2, %43 : vector<1x256xi32>
    %c16_i32_12 = arith.constant 16 : i32
    %45 = vector.broadcast %c16_i32_12 : i32 to vector<1x256xi32>
    %46 = arith.cmpi slt, %44, %45 : vector<1x256xi32>
    %47 = arith.andi %42, %46 : vector<1x256xi1>
    %c3_i32 = arith.constant 3 : i32
    %48 = vector.broadcast %c3_i32 : i32 to vector<1x256xi32>
    %49 = arith.addi %2, %48 : vector<1x256xi32>
    %c0_i32_13 = arith.constant 0 : i32
    %50 = vector.broadcast %c0_i32_13 : i32 to vector<1x256xi32>
    %51 = arith.cmpi sge, %49, %50 : vector<1x256xi32>
    %c3_i32_14 = arith.constant 3 : i32
    %52 = vector.broadcast %c3_i32_14 : i32 to vector<1x256xi32>
    %53 = arith.addi %2, %52 : vector<1x256xi32>
    %c16_i32_15 = arith.constant 16 : i32
    %54 = vector.broadcast %c16_i32_15 : i32 to vector<1x256xi32>
    %55 = arith.cmpi slt, %53, %54 : vector<1x256xi32>
    %56 = arith.andi %51, %55 : vector<1x256xi1>
    %57 = tpu.iota {dimensions = array<i32: 1>} : vector<1x384xi32>
    %c15_i32_16 = arith.constant 15 : i32
    %58 = vector.broadcast %c15_i32_16 : i32 to vector<1x384xi32>
    %59 = arith.andi %57, %58 : vector<1x384xi32>
    %c3_i32_17 = arith.constant 3 : i32
    %60 = vector.broadcast %c3_i32_17 : i32 to vector<1x384xi32>
    %61 = arith.cmpi sge, %59, %60 : vector<1x384xi32>
    %c13_i32 = arith.constant 13 : i32
    %62 = vector.broadcast %c13_i32 : i32 to vector<1x384xi32>
    %63 = arith.cmpi slt, %59, %62 : vector<1x384xi32>
    %64 = arith.andi %61, %63 : vector<1x384xi1>
    %cst = arith.constant 1.000000e+00 : f32
    %65 = vector.broadcast %cst : f32 to vector<1x384xf32>
    %c112 = arith.constant 112 : index
    %c0 = arith.constant 0 : index
    %66 = vector.load %arg6[%c112, %c0] : memref<113x384xf32, #tpu.memory_space<vmem>>, vector<1x384xf32>
    tpu.vector_store %arg6[%c112, %c0], %65 {strides = array<i32>} : memref<113x384xf32, #tpu.memory_space<vmem>>, vector<1x384xf32>,
    %cst_18 = arith.constant 1.000000e+00 : f32
    %67 = vector.broadcast %cst_18 : f32 to vector<1x256xf32>
    %c112_19 = arith.constant 112 : index
    %c0_20 = arith.constant 0 : index
    %68 = vector.load %arg7[%c112_19, %c0_20] : memref<113x256xf32, #tpu.memory_space<vmem>>, vector<1x256xf32>
    tpu.vector_store %arg7[%c112_19, %c0_20], %67 {strides = array<i32>} : memref<113x256xf32, #tpu.memory_space<vmem>>, vector<1x256xf32>,
    %cst_21 = arith.constant 0.000000e+00 : f32
    %69 = vector.broadcast %cst_21 : f32 to vector<4x512xf32>
    %c4 = arith.constant 4 : index
    %c0_22 = arith.constant 0 : index
    %70 = vector.load %arg5[%c4, %c0_22] : memref<8x512xf32, #tpu.memory_space<vmem>>, vector<4x512xf32>
    tpu.vector_store %arg5[%c4, %c0_22], %69 {strides = array<i32>} : memref<8x512xf32, #tpu.memory_space<vmem>>, vector<4x512xf32>,
    %cst_23 = arith.constant 0.000000e+00 : f32
    %71 = vector.broadcast %cst_23 : f32 to vector<4x48xf32>
    %c0_24 = arith.constant 0 : index
    %c0_25 = arith.constant 0 : index
    %72 = vector.load %arg5[%c0_24, %c0_25] : memref<8x512xf32, #tpu.memory_space<vmem>>, vector<4x48xf32>
    tpu.vector_store %arg5[%c0_24, %c0_25], %71 {strides = array<i32>} : memref<8x512xf32, #tpu.memory_space<vmem>>, vector<4x48xf32>,
    %cst_26 = arith.constant 0.000000e+00 : f32
    %73 = vector.broadcast %cst_26 : f32 to vector<4x112xf32>
    %c0_27 = arith.constant 0 : index
    %c400 = arith.constant 400 : index
    %74 = vector.load %arg5[%c0_27, %c400] : memref<8x512xf32, #tpu.memory_space<vmem>>, vector<4x112xf32>
    tpu.vector_store %arg5[%c0_27, %c400], %73 {strides = array<i32>} : memref<8x512xf32, #tpu.memory_space<vmem>>, vector<4x112xf32>,
    %cst_28 = arith.constant 0.000000e+00 : f32
    %75 = vector.broadcast %cst_28 : f32 to vector<4x48xf32>
    %c0_29 = arith.constant 0 : index
    %c48 = arith.constant 48 : index
    %76 = vector.load %arg5[%c0_29, %c48] : memref<8x512xf32, #tpu.memory_space<vmem>>, vector<4x48xf32>
    tpu.vector_store %arg5[%c0_29, %c48], %75 {strides = array<i32>} : memref<8x512xf32, #tpu.memory_space<vmem>>, vector<4x48xf32>,
    %cst_30 = arith.constant 0.000000e+00 : f32
    %77 = vector.broadcast %cst_30 : f32 to vector<4x48xf32>
    %c0_31 = arith.constant 0 : index
    %c352 = arith.constant 352 : index
    %78 = vector.load %arg5[%c0_31, %c352] : memref<8x512xf32, #tpu.memory_space<vmem>>, vector<4x48xf32>
    tpu.vector_store %arg5[%c0_31, %c352], %77 {strides = array<i32>} : memref<8x512xf32, #tpu.memory_space<vmem>>, vector<4x48xf32>,
    %c0_32 = arith.constant 0 : index
    %c0_33 = arith.constant 0 : index
    %c0_34 = arith.constant 0 : index
    %79 = vector.load %arg1[%c0_32, %c0_33, %c0_34] : memref<1x4x256xf32, #tpu.memory_space<vmem>>, vector<1x4x256xf32>
    %80 = vector.shape_cast %79 : vector<1x4x256xf32> to vector<4x256xf32>
    %c0_35 = arith.constant 0 : index
    %c96 = arith.constant 96 : index
    %81 = vector.load %arg5[%c0_35, %c96] : memref<8x512xf32, #tpu.memory_space<vmem>>, vector<4x256xf32>
    tpu.vector_store %arg5[%c0_35, %c96], %80 {strides = array<i32>} : memref<8x512xf32, #tpu.memory_space<vmem>>, vector<4x256xf32>,
    %c0_36 = arith.constant 0 : index
    %c0_37 = arith.constant 0 : index
    %82 = vector.load %arg5[%c0_36, %c0_37] : memref<8x512xf32, #tpu.memory_space<vmem>>, vector<8x352xf32>
    %c0_38 = arith.constant 0 : index
    %c0_39 = arith.constant 0 : index
    %83 = vector.load %arg6[%c0_38, %c0_39] : memref<113x384xf32, #tpu.memory_space<vmem>>, vector<8x352xf32>
    tpu.vector_store %arg6[%c0_38, %c0_39], %82 {strides = array<i32>} : memref<113x384xf32, #tpu.memory_space<vmem>>, vector<8x352xf32>,
    %c0_40 = arith.constant 0 : index
    %c45 = arith.constant 45 : index
    %84 = vector.load %arg5[%c0_40, %c45] : memref<8x512xf32, #tpu.memory_space<vmem>>, vector<8x352xf32>
    %c56 = arith.constant 56 : index
    %c0_41 = arith.constant 0 : index
    %85 = vector.load %arg6[%c56, %c0_41] : memref<113x384xf32, #tpu.memory_space<vmem>>, vector<8x352xf32>
    tpu.vector_store %arg6[%c56, %c0_41], %84 {strides = array<i32>} : memref<113x384xf32, #tpu.memory_space<vmem>>, vector<8x352xf32>,
    %c0_42 = arith.constant 0 : index
    %c16 = arith.constant 16 : index
    %86 = vector.load %arg5[%c0_42, %c16] : memref<8x512xf32, #tpu.memory_space<vmem>>, vector<8x352xf32>
    %c8 = arith.constant 8 : index
    %c0_43 = arith.constant 0 : index
    %87 = vector.load %arg6[%c8, %c0_43] : memref<113x384xf32, #tpu.memory_space<vmem>>, vector<8x352xf32>
    tpu.vector_store %arg6[%c8, %c0_43], %86 {strides = array<i32>} : memref<113x384xf32, #tpu.memory_space<vmem>>, vector<8x352xf32>,
    %c0_44 = arith.constant 0 : index
    %c46 = arith.constant 46 : index
    %88 = vector.load %arg5[%c0_44, %c46] : memref<8x512xf32, #tpu.memory_space<vmem>>, vector<8x352xf32>
    %c64 = arith.constant 64 : index
    %c0_45 = arith.constant 0 : index
    %89 = vector.load %arg6[%c64, %c0_45] : memref<113x384xf32, #tpu.memory_space<vmem>>, vector<8x352xf32>
    tpu.vector_store %arg6[%c64, %c0_45], %88 {strides = array<i32>} : memref<113x384xf32, #tpu.memory_space<vmem>>, vector<8x352xf32>,
    %c0_46 = arith.constant 0 : index
    %c32 = arith.constant 32 : index
    %90 = vector.load %arg5[%c0_46, %c32] : memref<8x512xf32, #tpu.memory_space<vmem>>, vector<8x352xf32>
    %c16_47 = arith.constant 16 : index
    %c0_48 = arith.constant 0 : index
    %91 = vector.load %arg6[%c16_47, %c0_48] : memref<113x384xf32, #tpu.memory_space<vmem>>, vector<8x352xf32>
    tpu.vector_store %arg6[%c16_47, %c0_48], %90 {strides = array<i32>} : memref<113x384xf32, #tpu.memory_space<vmem>>, vector<8x352xf32>,
    %c0_49 = arith.constant 0 : index
    %c47 = arith.constant 47 : index
    %92 = vector.load %arg5[%c0_49, %c47] : memref<8x512xf32, #tpu.memory_space<vmem>>, vector<8x352xf32>
    %c72 = arith.constant 72 : index
    %c0_50 = arith.constant 0 : index
    %93 = vector.load %arg6[%c72, %c0_50] : memref<113x384xf32, #tpu.memory_space<vmem>>, vector<8x352xf32>
    tpu.vector_store %arg6[%c72, %c0_50], %92 {strides = array<i32>} : memref<113x384xf32, #tpu.memory_space<vmem>>, vector<8x352xf32>,
    %c0_51 = arith.constant 0 : index
    %c48_52 = arith.constant 48 : index
    %94 = vector.load %arg5[%c0_51, %c48_52] : memref<8x512xf32, #tpu.memory_space<vmem>>, vector<8x352xf32>
    %c24 = arith.constant 24 : index
    %c0_53 = arith.constant 0 : index
    %95 = vector.load %arg6[%c24, %c0_53] : memref<113x384xf32, #tpu.memory_space<vmem>>, vector<8x352xf32>
    tpu.vector_store %arg6[%c24, %c0_53], %94 {strides = array<i32>} : memref<113x384xf32, #tpu.memory_space<vmem>>, vector<8x352xf32>,
    %c0_54 = arith.constant 0 : index
    %c48_55 = arith.constant 48 : index
    %96 = vector.load %arg5[%c0_54, %c48_55] : memref<8x512xf32, #tpu.memory_space<vmem>>, vector<8x352xf32>
    %c80 = arith.constant 80 : index
    %c0_56 = arith.constant 0 : index
    %97 = vector.load %arg6[%c80, %c0_56] : memref<113x384xf32, #tpu.memory_space<vmem>>, vector<8x352xf32>
    tpu.vector_store %arg6[%c80, %c0_56], %96 {strides = array<i32>} : memref<113x384xf32, #tpu.memory_space<vmem>>, vector<8x352xf32>,
    %c0_57 = arith.constant 0 : index
    %c64_58 = arith.constant 64 : index
    %98 = vector.load %arg5[%c0_57, %c64_58] : memref<8x512xf32, #tpu.memory_space<vmem>>, vector<8x352xf32>
    %c32_59 = arith.constant 32 : index
    %c0_60 = arith.constant 0 : index
    %99 = vector.load %arg6[%c32_59, %c0_60] : memref<113x384xf32, #tpu.memory_space<vmem>>, vector<8x352xf32>
    tpu.vector_store %arg6[%c32_59, %c0_60], %98 {strides = array<i32>} : memref<113x384xf32, #tpu.memory_space<vmem>>, vector<8x352xf32>,
    %c0_61 = arith.constant 0 : index
    %c49 = arith.constant 49 : index
    %100 = vector.load %arg5[%c0_61, %c49] : memref<8x512xf32, #tpu.memory_space<vmem>>, vector<8x352xf32>
    %c88 = arith.constant 88 : index
    %c0_62 = arith.constant 0 : index
    %101 = vector.load %arg6[%c88, %c0_62] : memref<113x384xf32, #tpu.memory_space<vmem>>, vector<8x352xf32>
    tpu.vector_store %arg6[%c88, %c0_62], %100 {strides = array<i32>} : memref<113x384xf32, #tpu.memory_space<vmem>>, vector<8x352xf32>,
    %c0_63 = arith.constant 0 : index
    %c80_64 = arith.constant 80 : index
    %102 = vector.load %arg5[%c0_63, %c80_64] : memref<8x512xf32, #tpu.memory_space<vmem>>, vector<8x352xf32>
    %c40 = arith.constant 40 : index
    %c0_65 = arith.constant 0 : index
    %103 = vector.load %arg6[%c40, %c0_65] : memref<113x384xf32, #tpu.memory_space<vmem>>, vector<8x352xf32>
    tpu.vector_store %arg6[%c40, %c0_65], %102 {strides = array<i32>} : memref<113x384xf32, #tpu.memory_space<vmem>>, vector<8x352xf32>,
    %c0_66 = arith.constant 0 : index
    %c50 = arith.constant 50 : index
    %104 = vector.load %arg5[%c0_66, %c50] : memref<8x512xf32, #tpu.memory_space<vmem>>, vector<8x352xf32>
    %c96_67 = arith.constant 96 : index
    %c0_68 = arith.constant 0 : index
    %105 = vector.load %arg6[%c96_67, %c0_68] : memref<113x384xf32, #tpu.memory_space<vmem>>, vector<8x352xf32>
    tpu.vector_store %arg6[%c96_67, %c0_68], %104 {strides = array<i32>} : memref<113x384xf32, #tpu.memory_space<vmem>>, vector<8x352xf32>,
    %c0_69 = arith.constant 0 : index
    %c96_70 = arith.constant 96 : index
    %106 = vector.load %arg5[%c0_69, %c96_70] : memref<8x512xf32, #tpu.memory_space<vmem>>, vector<8x352xf32>
    %c48_71 = arith.constant 48 : index
    %c0_72 = arith.constant 0 : index
    %107 = vector.load %arg6[%c48_71, %c0_72] : memref<113x384xf32, #tpu.memory_space<vmem>>, vector<8x352xf32>
    tpu.vector_store %arg6[%c48_71, %c0_72], %106 {strides = array<i32>} : memref<113x384xf32, #tpu.memory_space<vmem>>, vector<8x352xf32>,
    %c0_73 = arith.constant 0 : index
    %c51 = arith.constant 51 : index
    %108 = vector.load %arg5[%c0_73, %c51] : memref<8x512xf32, #tpu.memory_space<vmem>>, vector<8x352xf32>
    %c104 = arith.constant 104 : index
    %c0_74 = arith.constant 0 : index
    %109 = vector.load %arg6[%c104, %c0_74] : memref<113x384xf32, #tpu.memory_space<vmem>>, vector<8x352xf32>
    tpu.vector_store %arg6[%c104, %c0_74], %108 {strides = array<i32>} : memref<113x384xf32, #tpu.memory_space<vmem>>, vector<8x352xf32>,
    %c0_75 = arith.constant 0 : index
    %c0_76 = arith.constant 0 : index
    %110 = vector.load %arg2[%c0_75, %c0_76] : memref<16x113xf32, #tpu.memory_space<vmem>>, vector<16x113xf32>
    %c0_77 = arith.constant 0 : index
    %c0_78 = arith.constant 0 : index
    %111 = vector.load %arg6[%c0_77, %c0_78] : memref<113x384xf32, #tpu.memory_space<vmem>>, vector<113x384xf32>
    %cst_79 = arith.constant dense<0.000000e+00> : vector<16x384xf32>
    %112 = tpu.matmul %110, %111, %cst_79 {dimension_numbers = #tpu.dot_dimension_numbers<[1], [0], [0], [1], [0, 0, 1, 1], [], []>} : vector<16x113xf32>, vector<113x384xf32>, vector<16x384xf32> -> vector<16x384xf32>
    %113 = vector.extract_strided_slice %112 {offsets = [0, 0], sizes = [8, 384], strides = [1, 1]} : vector<16x384xf32> to vector<8x384xf32>
    %114 = vector.extract_strided_slice %112 {offsets = [8, 0], sizes = [8, 384], strides = [1, 1]} : vector<16x384xf32> to vector<8x384xf32>
    %cst_80 = arith.constant 0.000000e+00 : f32
    %115 = vector.shape_cast %64 : vector<1x384xi1> to vector<1x384xi1>
    %116 = vector.broadcast %115 : vector<1x384xi1> to vector<8x384xi1>
    %117 = vector.broadcast %cst_80 : f32 to vector<8x384xf32>
    %118 = arith.select %116, %114, %117 : vector<8x384xi1>, vector<8x384xf32>
    %119 = vector.extract_strided_slice %113 {offsets = [0, 45], sizes = [8, 256], strides = [1, 1]} : vector<8x384xf32> to vector<8x256xf32>
    %cst_81 = arith.constant 0.000000e+00 : f32
    %120 = vector.shape_cast %11 : vector<1x256xi1> to vector<1x256xi1>
    %121 = vector.broadcast %120 : vector<1x256xi1> to vector<8x256xi1>
    %122 = vector.broadcast %cst_81 : f32 to vector<8x256xf32>
    %123 = arith.select %121, %119, %122 : vector<8x256xi1>, vector<8x256xf32>
    %c0_82 = arith.constant 0 : index
    %c0_83 = arith.constant 0 : index
    %124 = vector.load %arg7[%c0_82, %c0_83] : memref<113x256xf32, #tpu.memory_space<vmem>>, vector<8x256xf32>
    tpu.vector_store %arg7[%c0_82, %c0_83], %123 {strides = array<i32>} : memref<113x256xf32, #tpu.memory_space<vmem>>, vector<8x256xf32>,
    %125 = vector.extract_strided_slice %118 {offsets = [0, 0], sizes = [8, 256], strides = [1, 1]} : vector<8x384xf32> to vector<8x256xf32>
    %c56_84 = arith.constant 56 : index
    %c0_85 = arith.constant 0 : index
    %126 = vector.load %arg7[%c56_84, %c0_85] : memref<113x256xf32, #tpu.memory_space<vmem>>, vector<8x256xf32>
    tpu.vector_store %arg7[%c56_84, %c0_85], %125 {strides = array<i32>} : memref<113x256xf32, #tpu.memory_space<vmem>>, vector<8x256xf32>,
    %127 = vector.extract_strided_slice %113 {offsets = [0, 46], sizes = [8, 256], strides = [1, 1]} : vector<8x384xf32> to vector<8x256xf32>
    %cst_86 = arith.constant 0.000000e+00 : f32
    %128 = vector.shape_cast %20 : vector<1x256xi1> to vector<1x256xi1>
    %129 = vector.broadcast %128 : vector<1x256xi1> to vector<8x256xi1>
    %130 = vector.broadcast %cst_86 : f32 to vector<8x256xf32>
    %131 = arith.select %129, %127, %130 : vector<8x256xi1>, vector<8x256xf32>
    %c8_87 = arith.constant 8 : index
    %c0_88 = arith.constant 0 : index
    %132 = vector.load %arg7[%c8_87, %c0_88] : memref<113x256xf32, #tpu.memory_space<vmem>>, vector<8x256xf32>
    tpu.vector_store %arg7[%c8_87, %c0_88], %131 {strides = array<i32>} : memref<113x256xf32, #tpu.memory_space<vmem>>, vector<8x256xf32>,
    %133 = vector.extract_strided_slice %118 {offsets = [0, 16], sizes = [8, 256], strides = [1, 1]} : vector<8x384xf32> to vector<8x256xf32>
    %c64_89 = arith.constant 64 : index
    %c0_90 = arith.constant 0 : index
    %134 = vector.load %arg7[%c64_89, %c0_90] : memref<113x256xf32, #tpu.memory_space<vmem>>, vector<8x256xf32>
    tpu.vector_store %arg7[%c64_89, %c0_90], %133 {strides = array<i32>} : memref<113x256xf32, #tpu.memory_space<vmem>>, vector<8x256xf32>,
    %135 = vector.extract_strided_slice %113 {offsets = [0, 47], sizes = [8, 256], strides = [1, 1]} : vector<8x384xf32> to vector<8x256xf32>
    %cst_91 = arith.constant 0.000000e+00 : f32
    %136 = vector.shape_cast %29 : vector<1x256xi1> to vector<1x256xi1>
    %137 = vector.broadcast %136 : vector<1x256xi1> to vector<8x256xi1>
    %138 = vector.broadcast %cst_91 : f32 to vector<8x256xf32>
    %139 = arith.select %137, %135, %138 : vector<8x256xi1>, vector<8x256xf32>
    %c16_92 = arith.constant 16 : index
    %c0_93 = arith.constant 0 : index
    %140 = vector.load %arg7[%c16_92, %c0_93] : memref<113x256xf32, #tpu.memory_space<vmem>>, vector<8x256xf32>
    tpu.vector_store %arg7[%c16_92, %c0_93], %139 {strides = array<i32>} : memref<113x256xf32, #tpu.memory_space<vmem>>, vector<8x256xf32>,
    %141 = vector.extract_strided_slice %118 {offsets = [0, 32], sizes = [8, 256], strides = [1, 1]} : vector<8x384xf32> to vector<8x256xf32>
    %c72_94 = arith.constant 72 : index
    %c0_95 = arith.constant 0 : index
    %142 = vector.load %arg7[%c72_94, %c0_95] : memref<113x256xf32, #tpu.memory_space<vmem>>, vector<8x256xf32>
    tpu.vector_store %arg7[%c72_94, %c0_95], %141 {strides = array<i32>} : memref<113x256xf32, #tpu.memory_space<vmem>>, vector<8x256xf32>,
    %143 = vector.extract_strided_slice %113 {offsets = [0, 48], sizes = [8, 256], strides = [1, 1]} : vector<8x384xf32> to vector<8x256xf32>
    %c24_96 = arith.constant 24 : index
    %c0_97 = arith.constant 0 : index
    %144 = vector.load %arg7[%c24_96, %c0_97] : memref<113x256xf32, #tpu.memory_space<vmem>>, vector<8x256xf32>
    tpu.vector_store %arg7[%c24_96, %c0_97], %143 {strides = array<i32>} : memref<113x256xf32, #tpu.memory_space<vmem>>, vector<8x256xf32>,
    %145 = vector.extract_strided_slice %118 {offsets = [0, 48], sizes = [8, 256], strides = [1, 1]} : vector<8x384xf32> to vector<8x256xf32>
    %c80_98 = arith.constant 80 : index
    %c0_99 = arith.constant 0 : index
    %146 = vector.load %arg7[%c80_98, %c0_99] : memref<113x256xf32, #tpu.memory_space<vmem>>, vector<8x256xf32>
    tpu.vector_store %arg7[%c80_98, %c0_99], %145 {strides = array<i32>} : memref<113x256xf32, #tpu.memory_space<vmem>>, vector<8x256xf32>,
    %147 = vector.extract_strided_slice %113 {offsets = [0, 49], sizes = [8, 256], strides = [1, 1]} : vector<8x384xf32> to vector<8x256xf32>
    %cst_100 = arith.constant 0.000000e+00 : f32
    %148 = vector.shape_cast %38 : vector<1x256xi1> to vector<1x256xi1>
    %149 = vector.broadcast %148 : vector<1x256xi1> to vector<8x256xi1>
    %150 = vector.broadcast %cst_100 : f32 to vector<8x256xf32>
    %151 = arith.select %149, %147, %150 : vector<8x256xi1>, vector<8x256xf32>
    %c32_101 = arith.constant 32 : index
    %c0_102 = arith.constant 0 : index
    %152 = vector.load %arg7[%c32_101, %c0_102] : memref<113x256xf32, #tpu.memory_space<vmem>>, vector<8x256xf32>
    tpu.vector_store %arg7[%c32_101, %c0_102], %151 {strides = array<i32>} : memref<113x256xf32, #tpu.memory_space<vmem>>, vector<8x256xf32>,
    %153 = vector.extract_strided_slice %118 {offsets = [0, 64], sizes = [8, 256], strides = [1, 1]} : vector<8x384xf32> to vector<8x256xf32>
    %c88_103 = arith.constant 88 : index
    %c0_104 = arith.constant 0 : index
    %154 = vector.load %arg7[%c88_103, %c0_104] : memref<113x256xf32, #tpu.memory_space<vmem>>, vector<8x256xf32>
    tpu.vector_store %arg7[%c88_103, %c0_104], %153 {strides = array<i32>} : memref<113x256xf32, #tpu.memory_space<vmem>>, vector<8x256xf32>,
    %155 = vector.extract_strided_slice %113 {offsets = [0, 50], sizes = [8, 256], strides = [1, 1]} : vector<8x384xf32> to vector<8x256xf32>
    %cst_105 = arith.constant 0.000000e+00 : f32
    %156 = vector.shape_cast %47 : vector<1x256xi1> to vector<1x256xi1>
    %157 = vector.broadcast %156 : vector<1x256xi1> to vector<8x256xi1>
    %158 = vector.broadcast %cst_105 : f32 to vector<8x256xf32>
    %159 = arith.select %157, %155, %158 : vector<8x256xi1>, vector<8x256xf32>
    %c40_106 = arith.constant 40 : index
    %c0_107 = arith.constant 0 : index
    %160 = vector.load %arg7[%c40_106, %c0_107] : memref<113x256xf32, #tpu.memory_space<vmem>>, vector<8x256xf32>
    tpu.vector_store %arg7[%c40_106, %c0_107], %159 {strides = array<i32>} : memref<113x256xf32, #tpu.memory_space<vmem>>, vector<8x256xf32>,
    %161 = vector.extract_strided_slice %118 {offsets = [0, 80], sizes = [8, 256], strides = [1, 1]} : vector<8x384xf32> to vector<8x256xf32>
    %c96_108 = arith.constant 96 : index
    %c0_109 = arith.constant 0 : index
    %162 = vector.load %arg7[%c96_108, %c0_109] : memref<113x256xf32, #tpu.memory_space<vmem>>, vector<8x256xf32>
    tpu.vector_store %arg7[%c96_108, %c0_109], %161 {strides = array<i32>} : memref<113x256xf32, #tpu.memory_space<vmem>>, vector<8x256xf32>,
    %163 = vector.extract_strided_slice %113 {offsets = [0, 51], sizes = [8, 256], strides = [1, 1]} : vector<8x384xf32> to vector<8x256xf32>
    %cst_110 = arith.constant 0.000000e+00 : f32
    %164 = vector.shape_cast %56 : vector<1x256xi1> to vector<1x256xi1>
    %165 = vector.broadcast %164 : vector<1x256xi1> to vector<8x256xi1>
    %166 = vector.broadcast %cst_110 : f32 to vector<8x256xf32>
    %167 = arith.select %165, %163, %166 : vector<8x256xi1>, vector<8x256xf32>
    %c48_111 = arith.constant 48 : index
    %c0_112 = arith.constant 0 : index
    %168 = vector.load %arg7[%c48_111, %c0_112] : memref<113x256xf32, #tpu.memory_space<vmem>>, vector<8x256xf32>
    tpu.vector_store %arg7[%c48_111, %c0_112], %167 {strides = array<i32>} : memref<113x256xf32, #tpu.memory_space<vmem>>, vector<8x256xf32>,
    %169 = vector.extract_strided_slice %118 {offsets = [0, 96], sizes = [8, 256], strides = [1, 1]} : vector<8x384xf32> to vector<8x256xf32>
    %c104_113 = arith.constant 104 : index
    %c0_114 = arith.constant 0 : index
    %170 = vector.load %arg7[%c104_113, %c0_114] : memref<113x256xf32, #tpu.memory_space<vmem>>, vector<8x256xf32>
    tpu.vector_store %arg7[%c104_113, %c0_114], %169 {strides = array<i32>} : memref<113x256xf32, #tpu.memory_space<vmem>>, vector<8x256xf32>,
    %c0_115 = arith.constant 0 : index
    %c0_116 = arith.constant 0 : index
    %171 = vector.load %arg3[%c0_115, %c0_116] : memref<8x113xf32, #tpu.memory_space<vmem>>, vector<8x113xf32>
    %c0_117 = arith.constant 0 : index
    %c0_118 = arith.constant 0 : index
    %172 = vector.load %arg7[%c0_117, %c0_118] : memref<113x256xf32, #tpu.memory_space<vmem>>, vector<113x256xf32>
    %cst_119 = arith.constant dense<0.000000e+00> : vector<8x256xf32>
    %173 = tpu.matmul %171, %172, %cst_119 {dimension_numbers = #tpu.dot_dimension_numbers<[1], [0], [0], [1], [0, 0, 1, 1], [], []>} : vector<8x113xf32>, vector<113x256xf32>, vector<8x256xf32> -> vector<8x256xf32>
    %c0_120 = arith.constant 0 : index
    %c0_121 = arith.constant 0 : index
    %c0_122 = arith.constant 0 : index
    %174 = vector.load %arg4[%c0_120, %c0_121, %c0_122] : memref<1x8x256xf32, #tpu.memory_space<vmem>>, vector<1x8x256xf32>
    %175 = vector.shape_cast %174 : vector<1x8x256xf32> to vector<8x256xf32>
    %176 = vector.shape_cast %173 : vector<8x256xf32> to vector<1x8x256xf32>
    tpu.vector_store %arg4[%c0_120, %c0_121, %c0_122], %176 {strides = array<i32>} : memref<1x8x256xf32, #tpu.memory_space<vmem>>, vector<1x8x256xf32>,
    return
  }
  func.func @transform_0(%arg0: i32) -> (i32, i32, i32) {
    %c0_i32 = arith.constant 0 : i32
    %c0_i32_0 = arith.constant 0 : i32
    %c0_i32_1 = arith.constant 0 : i32
    return %arg0, %c0_i32, %c0_i32_0 : i32, i32, i32
  }
  func.func @transform_1(%arg0: i32) -> (i32, i32) {
    %c0_i32 = arith.constant 0 : i32
    %c0_i32_0 = arith.constant 0 : i32
    %c0_i32_1 = arith.constant 0 : i32
    return %c0_i32, %c0_i32_0 : i32, i32
  }
  func.func @transform_2(%arg0: i32) -> (i32, i32) {
    %c0_i32 = arith.constant 0 : i32
    %c0_i32_0 = arith.constant 0 : i32
    %c0_i32_1 = arith.constant 0 : i32
    return %c0_i32, %c0_i32_0 : i32, i32
  }
  func.func @transform_3(%arg0: i32) -> (i32, i32, i32) {
    %c0_i32 = arith.constant 0 : i32
    %c0_i32_0 = arith.constant 0 : i32
    %c0_i32_1 = arith.constant 0 : i32
    return %arg0, %c0_i32, %c0_i32_0 : i32, i32, i32
  }
}

</mosaic_0001>

<bundles_post_ra>
// kernel: tpu_custom_call.1
= control target key start
LH: loop header
LB: loop body
LE: loop exit
PB: predicated region body
PF: predicated region fallthrough
CT: control target
= control target key end

     0   :  { %8 = vsyncpa [#allocation6], 0  ;;  %s2039_s0 = inlined_call_operand.hbm [shape: f32[2,4,256], index: 0, kind: input, shape index: {}]   ;;  %s2040_s1 = inlined_call_operand.hbm [shape: f32[16,113], index: 1, kind: input, shape index: {}]   ;;  %s2041_s2 = inlined_call_operand.hbm [shape: f32[8,113], index: 2, kind: input, shape index: {}]   ;;  %s2042_s3 = inlined_call_operand.hbm [shape: f32[2,8,256], index: 3, kind: output, shape index: {}]  }
   0x1   :  { %10 = vsyncpa [#allocation6 + $0x1], 0 }
   0x2   :  { %11 = vsyncpa [#allocation9], 0 }
   0x3   :  { %12 = vsyncpa [#allocation7], 0 }
   0x4   :  { %14 = vsyncpa [#allocation7 + $0x1], 0  ;;  %s1520_s12 = smov 0   ;;  %s1522_s13 = smov 0  }
   0x5   :  { %s1524_s14 = smov 0   ;;  %s1526_s15 = smov 0  }
   0x6 LB: > { %s130_s18 = sshll.u32 %s2040_s1, 4  ;;  %s1544_s19 = sadd.s32 4294967295, %s1480_s15   ;;  %s1480_s15 = sphi %s1526_s15, %s2072_s15   ;;  %s1476_s14 = sphi %s1524_s14, %s2071_s14   ;;  %s1472_s13 = sphi %s1522_s13, %s2070_s13   ;;  %s1468_s12 = sphi %s1520_s12, %s2069_s12   ;;  %s131_s18 = int_to_ptr.hbm [resolvable:$true] %s130_s18 }
   0x7   : > { %p1191_p0 = scmp.ge.s32.totalorder %s1480_s15, 1  ;;  %p41_p1 = scmp.eq.s32.totalorder %s1544_s19, 0 }
   0x8   : > { %p119_p2 = scmp.lt.s32.totalorder %s1480_s15, 3  ;;  %s1482_s21 = smov [#allocation8]  }
   0x9   : > { %s132_s22 = sshll.u32 %s1482_s21, 4  ;;  %s145_s25 = sshll.u32 %s2041_s2, 4  ;;  %s133_s22 = int_to_ptr.vmem [resolvable:$true] %s132_s22  ;;  %s146_s25 = int_to_ptr.hbm [resolvable:$true] %s145_s25 }
   0xa   : > { %p1549_p3 = pnand %p1191_p0, %p119_p2  ;;  %s1483_s26 = smov [#allocation10]  }
   0xb   : > { %s147_s27 = sshll.u32 %s1483_s26, 4  ;;  %s1484_s28 = smov 128   ;;  %s148_s27 = int_to_ptr.vmem [resolvable:$true] %s147_s27 }
   0xc   : > { %p1235_p4 = pneg %p1549_p3  ;;  %s1485_s29 = smov 8  }
   0xd   : > { %s1190_s30 = sadd.s32 4294967294, %s1480_s15   ;;  %s1563_s4 = sadd.s32 1, %s1480_s15  }
   0xe   : > { %p1236_p6 = pnand %p1235_p4, %p41_p1  ;;  %s24_s5 = ssub.s32 %s1480_s15, %s1563_s4 }
   0xf   : > { %s27_s6 = sadd.s32 1, %s1476_s14  ;;  %p25_p7 = scmp.eq.s32.totalorder %s24_s5, 0 }
  0x10   : > { %1238 = dma.hbm_to_vmem [thread:$0]  (!%p1236_p6), %s131_s18, 256, %s133_s22, [#allocation9], %s1484_s28, %s1484_s28, %s1485_s29  }
  0x11   : > { %1241 = dma.hbm_to_vmem [thread:$0]  (!%p1236_p6), %s146_s25, 128, %s148_s27, [#allocation9]  }
  0x12   : > { %p34_p8 = scmp.ne.s32.totalorder %s1476_s14, %s1472_s13  ;;  %p35_p9 = scmp.eq.s32.totalorder %s1480_s15, 0 }
  0x13   : > { %p40_p10 = scmp.ne.s32.totalorder %s1472_s13, %s1468_s12  ;;  %p106_p13 = scmp.eq.s32.totalorder %s1544_s19, 1 }
  0x14   : > { %s1574_s7 = scalar_select %p25_p7, %s1476_s14, %s27_s6  }
  0x15   : > { %p1576_p11 = por %p35_p9, %p34_p8  ;;  %p1582_p12 = por %p41_p1, %p40_p10 }
  0x16   : > { %p112_p0 = scmp.eq.s32.totalorder %s1190_s30, 1  ;;  %p1252_p2 = scmp.lt.s32.totalorder %s1480_s15, 2 }
  0x17   : > { %s158_s10 = sand.u32 1, %s1476_s14   ;;  %p1589_p4 = por %p106_p13, %p34_p8 }
  0x18   : > { %p1593_p6 = por %p112_p0, %p40_p10  ;;  %s1195_s17 = sshll.u32 %s158_s10, 3 }
  0x19   : > { %s1221_s18 = sshll.u32 %s1480_s15, 3  ;;  %s162_s24 = scalar_lea.vmem [#allocation5], %s1195_s17 }
  0x1a   : > { %s167_s23 = scalar_lea.hbm %s2039_s0, %s1221_s18  ;;  %s171_s25 = sshll.u32 %s162_s24, 4  ;;  %s172_s25 = int_to_ptr.vmem [resolvable:$true] %s171_s25 }
  0x1b   : > { %s169_s26 = sshll.u32 %s167_s23, 4  ;;  %p1603_p7 = pnand %p1252_p2, %p1576_p11  ;;  %s170_s26 = int_to_ptr.hbm [resolvable:$true] %s169_s26 }
  0x1c   : > { %s159_s28 = scalar_lea.sflag [#allocation6], %s158_s10  ;;  %s1380_s29 = sshra.s32 %s170_s26, 4  ;;  %s1381_s29 = int_to_ptr.hbm [resolvable:$true] %s1380_s29 }
  0x1d   : > { %s1382_s30 = scalar_lea.hbm %s1381_s29, 8  ;;  %p1384_p9 = pneg %p1603_p7 }
  0x1e   : > { %p1383_p8 = scmp.ne.s32.totalorder %s1381_s29, %s1382_s30  ;;  %s1387_s17 = scalar_lea.hbm %s2039_s0, 16 }
  0x1f   : > { %p1388_p11 = scmp.lt.s32.totalorder %s1381_s29, %s2039_s0  ;;  %p1389_p0 = scmp.lt.s32.totalorder %s1387_s17, %s1382_s30 }
  0x20   : > { %p1385_p10 = pnand %p1384_p9, %p1383_p8 }
  0x21   : > { %p1390_p2 = por %p1389_p0, %p1388_p11 }
  0x22   : > { %p1386_p13 = pneg %p1385_p10 }
  0x24   : > { %p1391_p5 = pnand %p1390_p2, %p1386_p13 }
  0x26   : > { %1394 = shalt.err (!%p1391_p5)
}
  0x27   : > { %1245 = dma.hbm_to_vmem [thread:$0]  (!%p1603_p7), %s170_s26, 128, %s172_s25, %s159_s28  }
  0x28   : > { %180 = sbr.rel (%p1549_p3) target bundleno = 886 (0x376), region = 32  ;;  %s1620_s10 = sand.u32 (!%p1549_p3), 1, %s1472_s13  }
  0x29   : > { %s1199_s21 = sshll.u32 (!%p1549_p3), %s1620_s10, 3  ;;  %s183_s22 = scalar_lea.sflag (!%p1549_p3), [#allocation6], %s1620_s10 }
  0x2a   : > { %s186_s23 = scalar_lea.vmem (!%p1549_p3), [#allocation5], %s1199_s21 }
  0x2d   : > { %1455 = dma.done.wait (%p1582_p12), %s183_s22, 128  }
  0x2e   : > { %1457 = vsyncadd (%p1582_p12), %s183_s22, 4294967168 }
  0x2f   : > { %1459 = dma.done.wait (%p41_p1), [#allocation9], 384  }
  0x30   : > { %1461 = vsyncadd (%p41_p1), [#allocation9], 4294966912  ;;  %vm302_vm0 = vcmask 1043584   ;;  %vm308_vm1 = vcmask 125952   ;;  %v1486_v0 = vmov 0.0   ;;  %v310_v1 = vld [vmem:[%s186_s23] sm:$0xff]  ;;  %v220_v13 = vlaneseq }
  0x31   : > { %299 = vst [vmem:[#allocation2 + $0x18] sm:$0xf0] %v1486_v0  ;;  %s1487_s20 = smov 78   ;;  %s1488_s9 = smov 77   ;;  %vm300_vm2 = vcmask 388096   ;;  %vm304_vm3 = vcmask 781696  }
  0x32   : > { %303 = vst.msk [vmem:[#allocation2 + $0x18] sm:$0xf] %vm302_vm0, %v1486_v0  ;;  %s1489_s24 = smov 79   ;;  %s1490_s25 = smov 96   ;;  %vm306_vm4 = vcmask 1044224   ;;  %vm319_vm5 = vcmask 785408  }
  0x33   : > { %309 = vst.msk [vmem:[#allocation2 + $0x18] sm:$0xf] %vm308_vm1, %v1486_v0  ;;  %s1491_s26 = smov 80   ;;  %s1492_s27 = smov 82   ;;  %vm326_vm6 = vcmask 781312   ;;  %vm286_vm7 = vcmp.lt.s32.totalorder %v220_v13, 384 }
  0x34   : > { %296 = vst [vmem:[#allocation2] sm:$0xf0] %v1486_v0  ;;  %s1493_s28 = smov 83   ;;  %s1494_s29 = smov 48   ;;  %v1498_v14 = vmov 1.0   ;;  %vm714_vm8 = vcmask 1040384  }
  0x35   : > { %297 = vst [vmem:[#allocation2 + $0x8] sm:$0xf0] %v1486_v0  ;;  %s1495_s30 = smov 81   ;;  %s1496_s5 = smov 64   ;;  %vm650_vm9 = vcmask 629760   ;;  %vm598_vm10 = vcmask 637952  }
  0x36   : > { %298 = vst [vmem:[#allocation2 + $0x10] sm:$0xf0] %v1486_v0  ;;  %s1497_s6 = smov 32   ;;  %s1499_s17 = smov 112   ;;  %vm546_vm11 = vcmask 646144   ;;  %vm2047_vm12 = vcmask 662528  }
  0x37   : > { %312 = vst [vmem:[#allocation1] ss:$2 sm:$0xff] %v310_v1  ;;  %vm469_vm13 = vcmask 654336   ;;  %vm2046_vm14 = vcmask 670720   ;;  %vm624_vm15 = vcmask 261120   ;;  %vm2044_vm0 = vcmask 678912  }
  0x38   : > { %301 = vst.msk [vmem:[#allocation2] sm:$0xf] %vm300_vm2, %v1486_v0  ;;  %vm572_vm1 = vcmask 392192   ;;  %vm520_vm2 = vcmask 523264   ;;  %s1202_s18 = sshll.u32 %s1620_s10, 4  ;;  %s1222_s8 = sshll.u32 %s1544_s19, 4 }
  0x39   : > { %305 = vst.msk [vmem:[#allocation2] sm:$0xf] %vm304_vm3, %v1486_v0  ;;  %vm2045_vm3 = vcmask 916480   ;;  %s1096_s23 = scalar_lea.hbm %s2042_s3, %s1222_s8 }
  0x3a   : > { %v585_v2 = vld [vmem:[#allocation2 + $0x18] sm:$0xff]  ;;  %307 = vst.msk [vmem:[#allocation2 + $0x10] sm:$0xf] %vm306_vm4, %v1486_v0 }
  0x3b   : > { %596 = vrot.lane.b32.xlu0 %v585_v2, %s1487_s20  ;;  %648 = vrot.lane.b32.xlu2 %v585_v2, %s1488_s9  ;;  %289 = vst.msk [vmem:[#allocation3 + $0x150] ss:$8 sm:$0x7] %vm286_vm7, %v1498_v14 }
  0x3c   : > { %544 = vrot.lane.b32.xlu1 %v585_v2, %s1489_s24 }
  0x3e   : > { %v313_v3 = vld.sshfl [vmem:[#allocation1] sm:$0xff pattern:$0x75316420]  ;;  %v314_v4 = vld.sshfl [vmem:[#allocation1 + $0x8] sm:$0xff pattern:$0x75316420] }
  0x42   : > { %v706_v16 = vld [vmem:[#allocation3 + $0x160] sm:$0x1]  ;;  %v704_v56 = vld [vmem:[#allocation3 + $0x150] sm:$0x1]  ;;  %v705_v57 = vld [vmem:[#allocation3 + $0x158] sm:$0x1] }
  0x43   : > { %315 = vrot.lane.b32.xlu0 %v313_v3, %s1490_s25  ;;  %493 = vrot.lane.b32.xlu2 %v585_v2, %s1491_s26 }
  0x44   : > { %395 = vrot.lane.b32.xlu1 %v585_v2, %s1492_s27  ;;  %1209 = vmatpush.msk.msra.mxu2 %vm714_vm8, %v706_v16 }
  0x45   : > { %1203 = vmatpush.msk.msra.mxu0 %vm714_vm8, %v704_v56  ;;  %1206 = vmatpush.msk.msra.mxu1 %vm714_vm8, %v705_v57 }
  0x4b   : > { %317 = vrot.lane.b32.xlu0 %v314_v4, %s1490_s25  ;;  %348 = vrot.lane.b32.xlu2 %v585_v2, %s1493_s28 }
  0x4c   : > { %570 = vrot.lane.b32.xlu1 %v585_v2, %s1494_s29 }
  0x53   : > { %441 = vrot.lane.b32.xlu0 %v585_v2, %s1495_s30  ;;  %518 = vrot.lane.b32.xlu2 %v585_v2, %s1496_s5 }
  0x5b   : > { %622 = vrot.lane.b32.xlu0 %v585_v2, %s1497_s6 }
  0x63   : > { %467 = vrot.lane.b32.xlu0 %v585_v2, %s1491_s26 }
  0x95   : > { %v649_v12 = vpop.permute.xlu2 %648 }
  0x9d   : > { %v494_v15 = vpop.permute.xlu2 %493 }
  0xa5   : > { %v1702_v17 = vpop.permute.xlu2 %348 }
  0xad   : > { %v1645_v5 = vpop.permute.xlu0 %596  ;;  %v1713_v20 = vpop.permute.xlu2 %518 }
  0xae   : > { %v545_v18 = vpop.permute.xlu1 %544 }
  0xb5   : > { %v316_v6 = vpop.permute.xlu0 %315 }
  0xb6   : > { %324 = vst.msk [vmem:[#allocation2] sm:$0xf] %vm306_vm4, %v316_v6  ;;  %v396_v22 = vpop.permute.xlu1 %395  ;;  %vm2043_vm4 = vcmask 924672  }
  0xbd   : > { %v318_v7 = vpop.permute.xlu0 %317  ;;  %v1647_v8 = vld [vmem:[#allocation2] sm:$0xff] }
  0xbe   : > { %v320_v9 = vsel %vm319_vm5, %v316_v6, %v318_v7  ;;  %327 = vst.msk [vmem:[#allocation2 + $0x10] sm:$0xf] %vm326_vm6, %v318_v7  ;;  %642 = vrot.lane.b32.xlu1 %v1647_v8, %s1488_s9  ;;  %590 = vrot.lane.b32.xlu0 %v1647_v8, %s1487_s20  ;;  %v571_v26 = vpop.permute.xlu1 %570 }
  0xbf   : > { %325 = vst [vmem:[#allocation2 + $0x8] sm:$0xf] %v320_v9 }
  0xc5   : > { %v636_v10 = vld [vmem:[#allocation2 + $0x10] sm:$0xff]  ;;  %v442_v19 = vpop.permute.xlu0 %441 }
  0xc6   : > { %646 = vrot.lane.b32.xlu2 %v636_v10, %s1488_s9  ;;  %542 = vrot.lane.b32.xlu0 %v636_v10, %s1489_s24  ;;  %v1656_v11 = vld [vmem:[#allocation2 + $0x8] sm:$0xff]  ;;  %333 = vst.msk [vmem:[#allocation3 + $0x10] sm:$0xff] %vm319_vm5, %v636_v10 }
  0xc7   : > { %538 = vrot.lane.b32.xlu1 %v1647_v8, %s1489_s24 }
  0xcd   : > { %v623_v21 = vpop.permute.xlu0 %622  ;;  %v664_v56 = vld [vmem:[#allocation3 + $0x10] sm:$0xff] }
  0xce   : > { %594 = vrot.lane.b32.xlu2 %v636_v10, %s1487_s20  ;;  %435 = vrot.lane.b32.xlu0 %v1647_v8, %s1495_s30 }
  0xcf   : > { %491 = vrot.lane.b32.xlu1 %v636_v10, %s1491_s26 }
  0xd5   : > { %v1728_v25 = vpop.permute.xlu0 %467 }
  0xd6   : > { %487 = vrot.lane.b32.xlu2 %v1647_v8, %s1491_s26  ;;  %393 = vrot.lane.b32.xlu0 %v636_v10, %s1492_s27 }
  0xd7   : > { %389 = vrot.lane.b32.xlu1 %v1647_v8, %s1492_s27 }
  0xde   : > { %439 = vrot.lane.b32.xlu2 %v636_v10, %s1495_s30  ;;  %616 = vrot.lane.b32.xlu0 %v1647_v8, %s1497_s6 }
  0xdf   : > { %346 = vrot.lane.b32.xlu1 %v636_v10, %s1493_s28 }
  0xe6   : > { %568 = vrot.lane.b32.xlu0 %v636_v10, %s1494_s29  ;;  %342 = vrot.lane.b32.xlu2 %v1647_v8, %s1493_s28 }
  0xe7   : > { %564 = vrot.lane.b32.xlu1 %v1647_v8, %s1494_s29 }
  0xee   : > { %461 = vrot.lane.b32.xlu0 %v1647_v8, %s1491_s26  ;;  %620 = vrot.lane.b32.xlu2 %v636_v10, %s1497_s6 }
  0xef   : > { %516 = vrot.lane.b32.xlu1 %v636_v10, %s1496_s5 }
  0xf6   : > { %417 = vrot.lane.b32.xlu0 %v636_v10, %s1490_s25  ;;  %512 = vrot.lane.b32.xlu2 %v1647_v8, %s1496_s5 }
  0xf7   : > { %413 = vrot.lane.b32.xlu1 %v1647_v8, %s1490_s25 }
  0xfe   : > { %489 = vrot.lane.b32.xlu0 %v1656_v11, %s1491_s26  ;;  %465 = vrot.lane.b32.xlu2 %v636_v10, %s1491_s26 }
  0xff   : > { %644 = vrot.lane.b32.xlu1 %v1656_v11, %s1488_s9 }
 0x106   : > { %344 = vrot.lane.b32.xlu0 %v1656_v11, %s1493_s28  ;;  %540 = vrot.lane.b32.xlu2 %v1656_v11, %s1489_s24 }
 0x107   : > { %592 = vrot.lane.b32.xlu1 %v1656_v11, %s1487_s20 }
 0x10e   : > { %514 = vrot.lane.b32.xlu0 %v1656_v11, %s1496_s5  ;;  %391 = vrot.lane.b32.xlu2 %v1656_v11, %s1492_s27 }
 0x10f   : > { %437 = vrot.lane.b32.xlu1 %v1656_v11, %s1495_s30 }
 0x116   : > { %370 = vrot.lane.b32.xlu0 %v636_v10, %s1499_s17  ;;  %566 = vrot.lane.b32.xlu2 %v1656_v11, %s1494_s29 }
 0x117   : > { %618 = vrot.lane.b32.xlu1 %v1656_v11, %s1497_s6 }
 0x11e   : > { %415 = vrot.lane.b32.xlu2 %v1656_v11, %s1490_s25 }
 0x11f   : > { %463 = vrot.lane.b32.xlu1 %v1656_v11, %s1491_s26 }
 0x120   : > { %v1721_v23 = vpop.permute.xlu2 %646 }
 0x121   : > { %v653_v24 = vsel %vm650_vm9, %v1721_v23, %v649_v12 }
 0x122   : > { %659 = vst.msk [vmem:[#allocation3 + $0x148] sm:$0xff] %vm319_vm5, %v653_v24 }
 0x126   : > { %368 = vrot.lane.b32.xlu2 %v1656_v11, %s1499_s17 }
 0x127   : > { %366 = vrot.lane.b32.xlu1 %v1647_v8, %s1499_s17 }
 0x128   : > { %v1732_v27 = vpop.permute.xlu2 %594 }
 0x129   : > { %v601_v28 = vsel %vm598_vm10, %v1732_v27, %v1645_v5  ;;  %v703_v29 = vld [vmem:[#allocation3 + $0x148] sm:$0xff] }
 0x12a   : > { %607 = vst.msk [vmem:[#allocation3 + $0x130] sm:$0xff] %vm319_vm5, %v601_v28  ;;  %772 = vmatpush.msra.mxu2 %v703_v29 }
 0x130   : > { %v1738_v30 = vpop.permute.xlu1 %642  ;;  %v1740_v31 = vpop.permute.xlu0 %590 }
 0x131   : > { %v1742_v32 = vpop.permute.xlu2 %487  ;;  %v700_v33 = vld [vmem:[#allocation3 + $0x130] sm:$0xff] }
 0x132   : > { %773 = vmatpush.msra.mxu2 %v700_v33 }
 0x138   : > { %v543_v34 = vpop.permute.xlu0 %542 }
 0x139   : > { %v549_v35 = vsel %vm546_vm11, %v543_v34, %v545_v18  ;;  %v539_v36 = vpop.permute.xlu1 %538  ;;  %v1745_v37 = vpop.permute.xlu2 %439 }
 0x13a   : > { %555 = vst.msk [vmem:[#allocation3 + $0x118] sm:$0xff] %vm319_vm5, %v549_v35  ;;  %v446_v38 = vsel %vm2047_vm12, %v1745_v37, %v442_v19 }
 0x13b   : > { %452 = vst.msk [vmem:[#allocation3 + $0xe8] sm:$0xff] %vm319_vm5, %v446_v38 }
 0x140   : > { %v1751_v39 = vpop.permute.xlu0 %435 }
 0x141   : > { %v1753_v40 = vpop.permute.xlu1 %491  ;;  %v1755_v41 = vpop.permute.xlu2 %342  ;;  %v697_v42 = vld [vmem:[#allocation3 + $0x118] sm:$0xff] }
 0x142   : > { %v497_v43 = vsel %vm469_vm13, %v1753_v40, %v494_v15  ;;  %774 = vmatpush.msra.mxu2 %v697_v42  ;;  %v691_v50 = vld [vmem:[#allocation3 + $0xe8] sm:$0xff] }
 0x143   : > { %503 = vst.msk [vmem:[#allocation3 + $0x100] sm:$0xff] %vm319_vm5, %v497_v43 }
 0x148   : > { %v394_v44 = vpop.permute.xlu0 %393 }
 0x149   : > { %v400_v45 = vsel %vm2046_vm14, %v394_v44, %v396_v22  ;;  %v390_v46 = vpop.permute.xlu1 %389  ;;  %v1761_v47 = vpop.permute.xlu2 %620 }
 0x14a   : > { %406 = vst.msk [vmem:[#allocation3 + $0xd0] sm:$0xff] %vm319_vm5, %v400_v45  ;;  %v627_v48 = vsel %vm624_vm15, %v1761_v47, %v623_v21  ;;  %v694_v49 = vld [vmem:[#allocation3 + $0x100] sm:$0xff] }
 0x14b   : > { %633 = vst.msk [vmem:[#allocation3 + $0xa0] sm:$0xff] %vm319_vm5, %v627_v48  ;;  %775 = vmatpush.msra.mxu2 %v694_v49 }
 0x14d   : > { %776 = vmatpush.msra.mxu2 %v691_v50 }
 0x150   : > { %v1767_v51 = vpop.permute.xlu0 %616 }
 0x151   : > { %v347_v52 = vpop.permute.xlu1 %346  ;;  %v1769_v53 = vpop.permute.xlu2 %512  ;;  %v688_v54 = vld [vmem:[#allocation3 + $0xd0] sm:$0xff] }
 0x152   : > { %v353_v55 = vsel %vm2044_vm0, %v347_v52, %v1702_v17  ;;  %777 = vmatpush.msra.mxu2 %v688_v54  ;;  %v682_v0 = vld [vmem:[#allocation3 + $0xa0] sm:$0xff] }
 0x153   : > { %359 = vst.msk [vmem:[#allocation3 + $0xb8] sm:$0xff] %vm319_vm5, %v353_v55 }
 0x158   : > { %v569_v58 = vpop.permute.xlu0 %568 }
 0x159   : > { %v575_v59 = vsel %vm572_vm1, %v569_v58, %v571_v26  ;;  %v565_v60 = vpop.permute.xlu1 %564  ;;  %v1777_v61 = vpop.permute.xlu2 %465 }
 0x15a   : > { %581 = vst.msk [vmem:[#allocation3 + $0x88] sm:$0xff] %vm319_vm5, %v575_v59  ;;  %v472_v62 = vsel %vm469_vm13, %v1777_v61, %v1728_v25  ;;  %v685_v63 = vld [vmem:[#allocation3 + $0xb8] sm:$0xff]  ;;  %v221_v59 = vand.u32 127, %v220_v13 }
 0x15b   : > { %478 = vst.msk [vmem:[#allocation3 + $0x58] sm:$0xff] %vm319_vm5, %v472_v62  ;;  %778 = vmatpush.msra.mxu2 %v685_v63 }
 0x15d   : > { %779 = vmatpush.msra.mxu2 %v682_v0 }
 0x160   : > { %v1784_v1 = vpop.permute.xlu0 %461 }
 0x161   : > { %v517_v2 = vpop.permute.xlu1 %516  ;;  %v541_v3 = vpop.permute.xlu2 %540  ;;  %v679_v4 = vld [vmem:[#allocation3 + $0x88] sm:$0xff] }
 0x162   : > { %v523_v5 = vsel %vm520_vm2, %v517_v2, %v1713_v20  ;;  %v547_v6 = vsel %vm546_vm11, %v539_v36, %v541_v3  ;;  %v548_v7 = vsel %vm546_vm11, %v541_v3, %v543_v34  ;;  %780 = vmatpush.msra.mxu2 %v679_v4  ;;  %v673_v18 = vld [vmem:[#allocation3 + $0x58] sm:$0xff] }
 0x163   : > { %529 = vst.msk [vmem:[#allocation3 + $0x70] sm:$0xff] %vm319_vm5, %v523_v5 }
 0x168   : > { %v418_v9 = vpop.permute.xlu0 %417 }
 0x169   : > { %426 = vst.msk [vmem:[#allocation3 + $0x40] sm:$0xff] %vm319_vm5, %v418_v9  ;;  %v414_v10 = vpop.permute.xlu1 %413  ;;  %v392_v12 = vpop.permute.xlu2 %391 }
 0x16a   : > { %v398_v15 = vsel %vm2046_vm14, %v390_v46, %v392_v12  ;;  %v399_v16 = vsel %vm2046_vm14, %v392_v12, %v394_v44  ;;  %v676_v17 = vld [vmem:[#allocation3 + $0x70] sm:$0xff] }
 0x16b   : > { %781 = vmatpush.msra.mxu2 %v676_v17 }
 0x16d   : > { %782 = vmatpush.msra.mxu2 %v673_v18 }
 0x170   : > { %v490_v19 = vpop.permute.xlu0 %489  ;;  %v670_v20 = vld [vmem:[#allocation3 + $0x40] sm:$0xff] }
 0x171   : > { %v495_v21 = vsel %vm469_vm13, %v1742_v32, %v490_v19  ;;  %v496_v22 = vsel %vm469_vm13, %v490_v19, %v1753_v40  ;;  %v645_v24 = vpop.permute.xlu1 %644  ;;  %v567_v25 = vpop.permute.xlu2 %566  ;;  %783 = vmatpush.msra.mxu2 %v670_v20 }
 0x172   : > { %v651_v26 = vsel %vm650_vm9, %v1738_v30, %v645_v24  ;;  %v652_v28 = vsel %vm650_vm9, %v645_v24, %v1721_v23  ;;  %v573_v29 = vsel %vm572_vm1, %v565_v60, %v567_v25  ;;  %v574_v33 = vsel %vm572_vm1, %v567_v25, %v569_v58  ;;  %v661_v58 = vld [vmem:[#allocation8 + $0x8] sm:$0xff] }
 0x173   : > { %726 = vmatpush.msra.mxu0 %v651_v26  ;;  %749 = vmatpush.msra.mxu1 %v652_v28 }
 0x178   : > { %v345_v34 = vpop.permute.xlu0 %344 }
 0x179   : > { %v351_v32 = vsel %vm2044_vm0, %v1755_v41, %v345_v34  ;;  %v352_v35 = vsel %vm2044_vm0, %v345_v34, %v347_v52  ;;  %v593_v36 = vpop.permute.xlu1 %592  ;;  %v416_v38 = vpop.permute.xlu2 %415 }
 0x17a   : > { %v599_v30 = vsel %vm598_vm10, %v1740_v31, %v593_v36  ;;  %v600_v23 = vsel %vm598_vm10, %v593_v36, %v1732_v27  ;;  %v419_v40 = vsel %vm319_vm5, %v414_v10, %v416_v38  ;;  %v420_v42 = vsel %vm319_vm5, %v416_v38, %v418_v9 }
 0x17b   : > { %727 = vmatpush.msra.mxu0 %v599_v30  ;;  %750 = vmatpush.msra.mxu1 %v600_v23 }
 0x17d   : > { %728 = vmatpush.msra.mxu0 %v547_v6  ;;  %751 = vmatpush.msra.mxu1 %v548_v7  ;;  %v273_v6 = vadd.s32 256, %v221_v59 }
 0x17f   : > { %729 = vmatpush.msra.mxu0 %v495_v21  ;;  %752 = vmatpush.msra.mxu1 %v496_v22  ;;  %v274_v7 = vand.u32 15, %v273_v6 }
 0x180   : > { %v515_v41 = vpop.permute.xlu0 %514 }
 0x181   : > { %v521_v43 = vsel %vm520_vm2, %v1769_v53, %v515_v41  ;;  %v522_v44 = vsel %vm520_vm2, %v515_v41, %v517_v2  ;;  %v438_v31 = vpop.permute.xlu1 %437  ;;  %v369_v46 = vpop.permute.xlu2 %368 }
 0x182   : > { %v444_v27 = vsel %vm2047_vm12, %v1751_v39, %v438_v31  ;;  %v445_v45 = vsel %vm2047_vm12, %v438_v31, %v1745_v37 }
 0x183   : > { %730 = vmatpush.msra.mxu0 %v444_v27  ;;  %753 = vmatpush.msra.mxu1 %v445_v45 }
 0x185   : > { %731 = vmatpush.msra.mxu0 %v398_v15  ;;  %754 = vmatpush.msra.mxu1 %v399_v16 }
 0x187   : > { %732 = vmatpush.msra.mxu0 %v351_v32  ;;  %755 = vmatpush.msra.mxu1 %v352_v35 }
 0x188   : > { %v371_v48 = vpop.permute.xlu0 %370 }
 0x189   : > { %v374_v49 = vsel %vm2045_vm3, %v369_v46, %v371_v48  ;;  %380 = vst.msk [vmem:[#allocation3 + $0x28] sm:$0xff] %vm319_vm5, %v371_v48  ;;  %v619_v50 = vpop.permute.xlu1 %618 }
 0x18a   : > { %v625_v39 = vsel %vm624_vm15, %v1767_v51, %v619_v50  ;;  %v626_v37 = vsel %vm624_vm15, %v619_v50, %v1761_v47  ;;  %v660_v51 = vld [vmem:[#allocation8] sm:$0xff] }
 0x18b   : > { %733 = vmatpush.msra.mxu0 %v625_v39  ;;  %756 = vmatpush.msra.mxu1 %v626_v37 }
 0x18d   : > { %734 = vmatpush.msra.mxu0 %v573_v29  ;;  %757 = vmatpush.msra.mxu1 %v574_v33 }
 0x18f   : > { %735 = vmatpush.msra.mxu0 %v521_v43  ;;  %758 = vmatpush.msra.mxu1 %v522_v44 }
 0x190   : > { %v667_v52 = vld [vmem:[#allocation3 + $0x28] sm:$0xff] }
 0x191   : > { %v464_v53 = vpop.permute.xlu1 %463  ;;  %784 = vmatpush.msra.mxu2 %v667_v52 }
 0x192   : > { %v470_v54 = vsel %vm469_vm13, %v1784_v1, %v464_v53  ;;  %v471_v55 = vsel %vm469_vm13, %v464_v53, %v1777_v61  ;;  %v1841_v61 = vand.u32 15, %v221_v59 }
 0x193   : > { %785 = vmatpush.msra.mxu2 %v664_v56  ;;  %736 = vmatpush.msra.mxu0 %v470_v54 }
 0x194   : > { %759 = vmatpush.msra.mxu1 %v471_v55  ;;  %1210 = vmatmul.msk.f32.vlgmr.msra.gmra.mxu2 %vm2043_vm4, %v660_v51  ;;  %vm278_vm0 = vcmp.lt.s32.totalorder %v1841_v61, 13  ;;  %v1908_v17 = vadd.s32 3, %v1841_v61  ;;  %v1916_v24 = vadd.s32 2, %v1841_v61  ;;  %v249_v29 = vadd.s32 1, %v1841_v61 }
 0x195   : > { %737 = vmatpush.msra.mxu0 %v419_v40 }
 0x196   : > { %760 = vmatpush.msra.mxu1 %v420_v42 }
 0x198   : > { %761 = vmatpush.msra.mxu1 %v374_v49 }
 0x199   : > { %v367_v47 = vpop.permute.xlu1 %366 }
 0x19a   : > { %v373_v57 = vsel %vm2045_vm3, %v367_v47, %v369_v46  ;;  %762 = vmatpush.msra.mxu1 %v1656_v11  ;;  %v222_v11 = vadd.s32 128, %v221_v59  ;;  %v233_v47 = vadd.s32 4294967294, %v1841_v61 }
 0x19b   : > { %1207 = vmatmul.msk.f32.vlgmr.msra.gmra.mxu1 %vm2043_vm4, %v660_v51  ;;  %738 = vmatpush.msra.mxu0 %v373_v57 }
 0x19c   : > { %1211 = vmatmul.msk.f32.gmra.mxu2 %vm2043_vm4, %v661_v58  ;;  %v1843_v63 = vand.u32 15, %v222_v11 }
 0x19d   : > { %739 = vmatpush.msra.mxu0 %v1647_v8  ;;  %v1002_v8 = vld [vmem:[#allocation10] sm:$0xff] }
 0x19e   : > { %1204 = vmatmul.msk.f32.vlgmr.msra.gmra.mxu0 %vm2043_vm4, %v660_v51  ;;  %vm276_vm6 = vcmp.ge.s32.totalorder %v1843_v63, 3  ;;  %vm279_vm7 = vcmp.lt.s32.totalorder %v1843_v63, 13  ;;  %v1930_v34 = vadd.s32 3, %v1843_v63  ;;  %v1945_v44 = vadd.s32 2, %v1843_v63 }
 0x19f   : > { %vm1851_vm3 = vmand %vm276_vm6, %vm279_vm7  ;;  %vm291_vm7 = vcmp.lt.s32.totalorder %v220_v13, 256  ;;  %v1919_v13 = vadd.s32 4294967295, %v1841_v61  ;;  %v234_v1 = vadd.s32 4294967294, %v1843_v63 }
 0x1a0   : > { %294 = vst.msk [vmem:[#allocation4 + $0xe0] ss:$8 sm:$0x3] %vm291_vm7, %v1498_v14  ;;  %vm253_vm7 = vcmp.lt.s32.totalorder %v249_v29, 16 }
 0x1a3   : > { %1208 = vmatmul.msk.f32.gmra.mxu1 %vm2043_vm4, %v661_v58 }
 0x1a6   : > { %1205 = vmatmul.msk.f32.gmra.mxu0 %vm2043_vm4, %v661_v58  ;;  %vm275_vm4 = vcmp.ge.s32.totalorder %v1841_v61, 3 }
 0x1a7   : > { %vm1858_vm14 = vmand %vm275_vm4, %vm278_vm0  ;;  %vm277_vm0 = vcmp.ge.s32.totalorder %v274_v7, 3  ;;  %vm280_vm4 = vcmp.lt.s32.totalorder %v274_v7, 13  ;;  %v1031_v18 = vld [vmem:[#allocation4 + $0xe0] sm:$0x1]  ;;  %v1032_v42 = vld [vmem:[#allocation4 + $0xe8] sm:$0x1] }
 0x1a8   : > { %vm283_vm6 = vmand %vm277_vm0, %vm280_vm4  ;;  %vm269_vm0 = vcmp.lt.s32.totalorder %v1908_v17, 16  ;;  %1212 = vmatpush.msk.msra.mxu3 %vm714_vm8, %v1031_v18  ;;  %vm270_vm4 = vcmp.lt.s32.totalorder %v1930_v34, 16  ;;  %1214 = vmatpush.msk.msrb.mxu0 %vm714_vm8, %v1032_v42  ;;  %vm235_vm8 = vcmp.ge.s32.totalorder %v233_v47, 0 }
 0x217   : > { %v787_v5 = vpop.f32.mrf.mxu2 }
 0x218   : > { %v764_v60 = vpop.f32.mrf.mxu1 }
 0x219   : > { %978 = vrot.lane.b32.xlu0 %v764_v60, %s1488_s9 }
 0x21b   : > { %v741_v62 = vpop.f32.mrf.mxu0 }
 0x21c   : > { %862 = vrot.lane.b32.xlu1 %v741_v62, %s1495_s30  ;;  %976 = vrot.lane.b32.xlu2 %v741_v62, %s1488_s9 }
 0x21f   : > { %v790_v9 = vpop.f32.mrf.mxu2 }
 0x220   : > { %v1855_v0 = vpop.f32.mrf.mxu1  ;;  %v801_v10 = vsel %vm283_vm6, %v790_v9, 0.0  ;;  %vm243_vm6 = vcmp.ge.s32.totalorder %v1919_v13, 0 }
 0x221   : > { %948 = vrot.lane.b32.xlu0 %v764_v60, %s1487_s20  ;;  %v800_v2 = vsel %vm1851_vm3, %v1855_v0, 0.0 }
 0x223   : > { %v1865_v3 = vpop.f32.mrf.mxu0 }
 0x224   : > { %829 = vrot.lane.b32.xlu1 %v741_v62, %s1492_s27  ;;  %946 = vrot.lane.b32.xlu2 %v741_v62, %s1487_s20  ;;  %v799_v4 = vsel %vm1858_vm14, %v1865_v3, 0.0 }
 0x229   : > { %918 = vrot.lane.b32.xlu0 %v764_v60, %s1489_s24 }
 0x22c   : > { %980 = vrot.lane.b32.xlu1 %v787_v5, %s1488_s9  ;;  %916 = vrot.lane.b32.xlu2 %v741_v62, %s1489_s24 }
 0x231   : > { %890 = vrot.lane.b32.xlu0 %v764_v60, %s1491_s26 }
 0x234   : > { %888 = vrot.lane.b32.xlu2 %v741_v62, %s1491_s26  ;;  %990 = vrot.lane.b32.xlu1 %v799_v4, %s1497_s6 }
 0x239   : > { %950 = vrot.lane.b32.xlu0 %v787_v5, %s1487_s20  ;;  %s219_s20 = scalar_lea.vmem [#allocation11], %s1202_s18 }
 0x23a   : > { %s1098_s9 = sshll.u32 %s219_s20, 4  ;;  %s1099_s9 = int_to_ptr.vmem [resolvable:$true] %s1098_s9 }
 0x23c   : > { %864 = vrot.lane.b32.xlu2 %v764_v60, %s1495_s30  ;;  %962 = vrot.lane.b32.xlu1 %v800_v2, %s1494_s29 }
 0x241   : > { %960 = vrot.lane.b32.xlu0 %v799_v4, %s1494_s29 }
 0x244   : > { %992 = vrot.lane.b32.xlu2 %v800_v2, %s1497_s6  ;;  %900 = vrot.lane.b32.xlu1 %v799_v4, %s1491_s26 }
 0x249   : > { %932 = vrot.lane.b32.xlu0 %v800_v2, %s1496_s5 }
 0x24c   : > { %930 = vrot.lane.b32.xlu2 %v799_v4, %s1496_s5  ;;  %876 = vrot.lane.b32.xlu1 %v799_v4, %s1490_s25 }
 0x251   : > { %994 = vrot.lane.b32.xlu0 %v801_v10, %s1497_s6 }
 0x254   : > { %902 = vrot.lane.b32.xlu2 %v800_v2, %s1491_s26  ;;  %846 = vrot.lane.b32.xlu1 %v799_v4, %s1499_s17 }
 0x259   : > { %964 = vrot.lane.b32.xlu0 %v801_v10, %s1494_s29  ;;  %s1430_s29 = scalar_lea.hbm %s2042_s3, 32 }
 0x25c   : > { %878 = vrot.lane.b32.xlu2 %v800_v2, %s1490_s25  ;;  %904 = vrot.lane.b32.xlu1 %v801_v10, %s1491_s26 }
 0x261   : > { %934 = vrot.lane.b32.xlu0 %v801_v10, %s1496_s5 }
 0x264   : > { %848 = vrot.lane.b32.xlu2 %v800_v2, %s1499_s17  ;;  %880 = vrot.lane.b32.xlu1 %v801_v10, %s1490_s25  ;;  %s1085_s25 = scalar_lea.sflag [#allocation7], %s1620_s10 }
 0x269   : > { %920 = vrot.lane.b32.xlu0 %v787_v5, %s1489_s24  ;;  %s1100_s24 = sshll.u32 %s1096_s23, 4  ;;  %s1101_s24 = int_to_ptr.hbm [resolvable:$true] %s1100_s24 }
 0x26c   : > { %831 = vrot.lane.b32.xlu2 %v764_v60, %s1492_s27  ;;  %850 = vrot.lane.b32.xlu1 %v801_v10, %s1499_s17 }
 0x271   : > { %892 = vrot.lane.b32.xlu0 %v787_v5, %s1491_s26  ;;  %s1424_s26 = sshra.s32 %s1101_s24, 4  ;;  %s1425_s26 = int_to_ptr.hbm [resolvable:$true] %s1424_s26 }
 0x272   : > { %p1431_p12 = scmp.lt.s32.totalorder %s1425_s26, %s2042_s3 }
 0x274   : > { %811 = vrot.lane.b32.xlu2 %v764_v60, %s1493_s28  ;;  %809 = vrot.lane.b32.xlu1 %v741_v62, %s1493_s28 }
 0x276   : > { %v977_v12 = vpop.permute.xlu2 %976 }
 0x279   : > { %813 = vrot.lane.b32.xlu0 %v787_v5, %s1493_s28 }
 0x27c   : > { %833 = vrot.lane.b32.xlu2 %v787_v5, %s1492_s27  ;;  %866 = vrot.lane.b32.xlu1 %v787_v5, %s1495_s30  ;;  %s1426_s27 = scalar_lea.hbm %s1425_s26, 16 }
 0x27d   : > { %p1427_p1 = scmp.ne.s32.totalorder %s1425_s26, %s1426_s27  ;;  %p1432_p7 = scmp.lt.s32.totalorder %s1430_s29, %s1426_s27 }
 0x27e   : > { %v947_v15 = vpop.permute.xlu2 %946 }
 0x27f   : > { %p1428_p3 = pnand %p1427_p1, %p1589_p4  ;;  %p1433_p8 = por %p1432_p7, %p1431_p12 }
 0x281   : > { %p1429_p5 = pneg %p1428_p3 }
 0x283   : > { %p1434_p9 = pnand %p1433_p8, %p1429_p5 }
 0x286   : > { %v917_v16 = vpop.permute.xlu2 %916 }
 0x28b   : > { %v979_v19 = vpop.permute.xlu0 %978 }
 0x28c   : > { %v1913_v20 = vsel %vm650_vm9, %v977_v12, %v979_v19 }
 0x28e   : > { %v863_v21 = vpop.permute.xlu1 %862  ;;  %v889_v22 = vpop.permute.xlu2 %888 }
 0x293   : > { %v949_v14 = vpop.permute.xlu0 %948 }
 0x294   : > { %v952_v25 = vsel %vm598_vm10, %v947_v15, %v949_v14  ;;  %v250_v15 = vadd.s32 1, %v1843_v63 }
 0x296   : > { %v830_v26 = vpop.permute.xlu1 %829  ;;  %v1924_v28 = vpop.permute.xlu2 %864 }
 0x297   : > { %v868_v33 = vsel %vm2047_vm12, %v863_v21, %v1924_v28  ;;  %vm262_vm12 = vcmp.lt.s32.totalorder %v1945_v44, 16 }
 0x29b   : > { %v1932_v32 = vpop.permute.xlu0 %918 }
 0x29c   : > { %v922_v35 = vsel %vm546_vm11, %v917_v16, %v1932_v32 }
 0x29e   : > { %v981_v36 = vpop.permute.xlu1 %980  ;;  %v993_v38 = vpop.permute.xlu2 %992 }
 0x29f   : > { %v1938_v30 = vsel %vm650_vm9, %v979_v19, %v981_v36  ;;  %vm2058_vm9 = vcmask 670720  }
 0x2a3   : > { %v1940_v23 = vpop.permute.xlu0 %890 }
 0x2a4   : > { %v894_v40 = vsel %vm469_vm13, %v889_v22, %v1940_v23  ;;  %v225_v22 = vadd.s32 4294967293, %v1841_v61 }
 0x2a6   : > { %v931_v41 = vpop.permute.xlu2 %930  ;;  %v991_v43 = vpop.permute.xlu1 %990 }
 0x2a7   : > { %v996_v31 = vsel %vm624_vm15, %v991_v43, %v993_v38 }
 0x2a8   : > { %1044 = vmatpush.msra.mxu3 %v996_v31 }
 0x2ab   : > { %v951_v27 = vpop.permute.xlu0 %950 }
 0x2ac   : > { %v1951_v45 = vsel %vm598_vm10, %v949_v14, %v951_v27  ;;  %vm2059_vm10 = vcmask 916480  }
 0x2ae   : > { %v903_v46 = vpop.permute.xlu2 %902  ;;  %v963_v48 = vpop.permute.xlu1 %962 }
 0x2b3   : > { %v961_v49 = vpop.permute.xlu0 %960 }
 0x2b4   : > { %v966_v50 = vsel %vm572_vm1, %v961_v49, %v963_v48 }
 0x2b5   : > { %1045 = vmatpush.msra.mxu3 %v966_v50 }
 0x2b6   : > { %v879_v39 = vpop.permute.xlu2 %878  ;;  %v901_v37 = vpop.permute.xlu1 %900 }
 0x2b7   : > { %v906_v52 = vsel %vm469_vm13, %v901_v37, %v903_v46 }
 0x2bb   : > { %v933_v53 = vpop.permute.xlu0 %932 }
 0x2bc   : > { %v936_v54 = vsel %vm520_vm2, %v931_v41, %v933_v53 }
 0x2bd   : > { %1046 = vmatpush.msra.mxu3 %v936_v54 }
 0x2be   : > { %v849_v55 = vpop.permute.xlu2 %848  ;;  %v877_v56 = vpop.permute.xlu1 %876 }
 0x2bf   : > { %v882_v51 = vsel %vm319_vm5, %v877_v56, %v879_v39  ;;  %1047 = vmatpush.msra.mxu3 %v906_v52 }
 0x2c1   : > { %1048 = vmatpush.msra.mxu3 %v882_v51 }
 0x2c3   : > { %v995_v57 = vpop.permute.xlu0 %994 }
 0x2c4   : > { %v997_v58 = vsel %vm624_vm15, %v993_v38, %v995_v57  ;;  %vm2060_vm15 = vcmp.lt.s32.totalorder %v1916_v24, 16 }
 0x2c5   : > { %1064 = vmatpush.msrb.mxu0 %v997_v58 }
 0x2c6   : > { %v832_v59 = vpop.permute.xlu2 %831  ;;  %v847_v60 = vpop.permute.xlu1 %846 }
 0x2c7   : > { %v835_v11 = vsel %vm2058_vm9, %v830_v26, %v832_v59  ;;  %v852_v62 = vsel %vm2059_vm10, %v847_v60, %v849_v55 }
 0x2c8   : > { %1049 = vmatpush.msra.mxu3 %v852_v62 }
 0x2ca   : > { %1306 = vmatpush.msk.msra.mxu3 %vm1858_vm14, %v1865_v3  ;;  %vm236_vm14 = vcmp.ge.s32.totalorder %v234_v1, 0 }
 0x2cb   : > { %v965_v2 = vpop.permute.xlu0 %964 }
 0x2cc   : > { %v967_v4 = vsel %vm572_vm1, %v963_v48, %v965_v2  ;;  %1307 = vmatpush.msk.msra.mxu3 %vm269_vm0, %v1913_v20  ;;  %vm2061_vm1 = vmmov %vm2058_vm9  ;;  %vm254_vm0 = vcmp.lt.s32.totalorder %v250_v15, 16 }
 0x2cd   : > { %1065 = vmatpush.msrb.mxu0 %v967_v4 }
 0x2ce   : > { %v812_v5 = vpop.permute.xlu2 %811  ;;  %v905_v6 = vpop.permute.xlu1 %904  ;;  %1308 = vmatpush.msk.msra.mxu3 %vm2060_vm15, %v952_v25  ;;  %v226_v25 = vadd.s32 4294967293, %v1843_v63 }
 0x2cf   : > { %v907_v7 = vsel %vm469_vm13, %v903_v46, %v905_v6 }
 0x2d0   : > { %1309 = vmatpush.msk.msra.mxu3 %vm253_vm7, %v922_v35 }
 0x2d2   : > { %1054 = vmatpush.msra.mxu3 %v894_v40 }
 0x2d3   : > { %v935_v3 = vpop.permute.xlu0 %934 }
 0x2d4   : > { %v937_v9 = vsel %vm520_vm2, %v933_v53, %v935_v3  ;;  %1310 = vmatpush.msk.msra.mxu3 %vm243_vm6, %v868_v33  ;;  %vm2062_vm2 = vmmov %vm2059_vm10 }
 0x2d5   : > { %1066 = vmatpush.msrb.mxu0 %v937_v9 }
 0x2d6   : > { %v834_v10 = vpop.permute.xlu2 %833  ;;  %v881_v12 = vpop.permute.xlu1 %880  ;;  %1311 = vmatpush.msk.msra.mxu3 %vm235_vm8, %v835_v11 }
 0x2d7   : > { %v836_v16 = vsel %vm2061_vm1, %v832_v59, %v834_v10  ;;  %v883_v17 = vsel %vm319_vm5, %v879_v39, %v881_v12  ;;  %1067 = vmatpush.msrb.mxu0 %v907_v7  ;;  %vm227_vm5 = vcmp.ge.s32.totalorder %v225_v22, 0 }
 0x2d9   : > { %1068 = vmatpush.msrb.mxu0 %v883_v17 }
 0x2db   : > { %v921_v18 = vpop.permute.xlu0 %920 }
 0x2dc   : > { %v923_v19 = vsel %vm546_vm11, %v1932_v32, %v921_v18  ;;  %vm2063_vm11 = vcmask 678912  }
 0x2de   : > { %v851_v20 = vpop.permute.xlu1 %850 }
 0x2df   : > { %v853_v21 = vsel %vm2062_vm2, %v849_v55, %v851_v20 }
 0x2e0   : > { %1069 = vmatpush.msrb.mxu0 %v853_v21 }
 0x2e2   : > { %1312 = vmatpush.msk.msrb.mxu0 %vm1851_vm3, %v1855_v0  ;;  %v242_v0 = vadd.s32 4294967295, %v1843_v63  ;;  %vm2064_vm3 = vcmask 924672  }
 0x2e3   : > { %v893_v24 = vpop.permute.xlu0 %892  ;;  %vm2067_vm7 = vmmov %vm2064_vm3 }
 0x2e4   : > { %v895_v13 = vsel %vm469_vm13, %v1940_v23, %v893_v24  ;;  %1313 = vmatpush.msk.msrb.mxu0 %vm270_vm4, %v1938_v30  ;;  %vm228_vm13 = vcmp.ge.s32.totalorder %v226_v25, 0  ;;  %vm2065_vm4 = vmmov %vm2063_vm11  ;;  %vm244_vm6 = vcmp.ge.s32.totalorder %v242_v0, 0 }
 0x2e6   : > { %v810_v14 = vpop.permute.xlu1 %809  ;;  %1314 = vmatpush.msk.msrb.mxu0 %vm262_vm12, %v1951_v45  ;;  %vm2066_vm12 = vcmask 662528  }
 0x2e7   : > { %v815_v61 = vsel %vm2063_vm11, %v810_v14, %v812_v5 }
 0x2e8   : > { %1315 = vmatpush.msk.msrb.mxu0 %vm254_vm0, %v923_v19  ;;  %1316 = vmatpush.msk.msra.mxu3 %vm227_vm5, %v815_v61 }
 0x2e9   : > { %1213 = vmatmul.msk.f32.vlgmr.msra.gmra.mxu3 %vm2064_vm3, %v1002_v8 }
 0x2ea   : > { %1074 = vmatpush.msrb.mxu0 %v895_v13 }
 0x2eb   : > { %v814_v26 = vpop.permute.xlu0 %813 }
 0x2ec   : > { %v816_v29 = vsel %vm2065_vm4, %v812_v5, %v814_v26 }
 0x2ee   : > { %v867_v33 = vpop.permute.xlu1 %866 }
 0x2ef   : > { %v869_v34 = vsel %vm2066_vm12, %v1924_v28, %v867_v33 }
 0x2f0   : > { %1317 = vmatpush.msk.msrb.mxu0 %vm244_vm6, %v869_v34 }
 0x2f2   : > { %1318 = vmatpush.msk.msrb.mxu0 %vm236_vm14, %v836_v16 }
 0x2f4   : > { %1319 = vmatpush.msk.msrb.mxu0 %vm228_vm13, %v816_v29 }
 0x2f5   : > { %1215 = vmatmul.msk.f32.vlgmr.msrb.gmra.mxu0 %vm2067_vm7, %v1002_v8 }
 0x36c   : > { %v1059_v63 = vpop.f32.mrf.mxu3 }
 0x36d   : > { %1082 = vst [vmem:[%s219_s20] sm:$0xff] %v1059_v63 }
 0x372   : > { %v1079_v28 = vpop.f32.mrf.mxu0 }
 0x373   : > { %1083 = vst [vmem:[%s219_s20 + $0x8] sm:$0xff] %v1079_v28 }
 0x374   : > { %1437 = shalt.err (!%p1434_p9)
}
 0x375   : > { %1233 = dma.vmem_to_hbm [thread:$0]  (%p1589_p4), %s1099_s9, 256, %s1101_s24, %s1085_s25  }
 0x376 PF: > { %s1112_s10 = sand.u32 1, %s1468_s12   ;;  %p2068_p10 = scmp.ge.s32.totalorder %s1480_s15, 2 }
 0x377   : > { %s1113_s6 = scalar_lea.sflag [#allocation7], %s1112_s10 }
 0x378   : > { %p1247_p13 = pnand %p2068_p10, %p1593_p6 }
 0x37a   : > { %p1248_p11 = pneg %p1247_p13 }
 0x37c   : > { %1463 = dma.done.wait (%p1248_p11), %s1113_s6, 256  }
 0x37d   : > { %1465 = vsyncadd (%p1248_p11), %s1113_s6, 4294967040  ;;  %p17_p0 = scmp.ge.s32.totalorder %s1563_s4, 4   ;;  %s2069_s12 = smov %s1472_s13 }
 0x37e   : > { %s2070_s13 = smov %s1476_s14  ;;  %s2071_s14 = smov %s1574_s7 }
 0x37f   : > { %s2072_s15 = smov %s1563_s4  ;;  %19 = sbr.rel (!%p17_p0) target bundleno = 6 (0x6), region = 87 }
 0x384   :  { %1119 = vsyncpa [#allocation6], 1 }
 0x385   :  { %1121 = vsyncpa [#allocation6 + $0x1], 1 }
 0x386   :  { %1122 = vsyncpa [#allocation9], 1 }
 0x387   :  { %1123 = vsyncpa [#allocation7], 1 }
 0x388   :  { %1125 = vsyncpa [#allocation7 + $0x1], 1 }

</bundles_post_ra>
